<compile_context>
chip_gen: v6e
topology: v6e:2x2x1
jax: 0.10.0
libtpu: 0.0.40
codegen_flags: <defaults>
</compile_context>

<pallas_src>
import functools

import jax
import jax.numpy as jnp
import numpy as np
from jax import lax
from jax.experimental import pallas as pl
from jax.experimental.pallas import tpu as pltpu


def _round_up(x: int, m: int) -> int:
    return ((x + m - 1) // m) * m


def _pick_row_tile(n0, h, n1p, d, out_bytes, mm_bytes):
    """Rows of z0 per grid step: multiple of 8, capped at 32, and sized so the
    per-step VMEM working set (double-buffered out block + ybuf scratch + z1 +
    weights) stays under ~24 MiB -- safe on v5e/v6e (128 MiB) and v7x (64 MiB)."""
    cap = max(8, min(32, _round_up(n0, 8)))
    fixed = (8 * h * n1p * out_bytes          # ybuf scratch (one 8-row chunk)
             + 2 * d * n1p * mm_bytes         # z1 block (double buffered)
             + 4 * h * d * mm_bytes)          # weights (abs + mul)
    budget = 24 * 1024 * 1024
    rt = 8
    for cand in (32, 24, 16, 8):
        if cand <= cap and fixed + 2 * h * cand * n1p * out_bytes <= budget:
            rt = cand
            break
    return min(rt, cap)


def _row_activation(at, ct, wa, wm, bias_b, t):
    """ReLU(1x1 conv) for z0 row t against all z1 columns -> (H, N1p) float32.

    at: (D, TI) z0 tile (features on sublanes, rows on lanes)  [mm dtype]
    ct: (D, N1p) transposed z1 (N1 on lanes -> lane-dense MXU output) [mm dtype]
    """
    a_col = at[:, t:t + 1]                                # (D, 1)  static lane slice
    diff = jnp.abs(a_col - ct)                            # (D, N1p) |z0_i - z1_j|
    mul = a_col * ct                                      # (D, N1p)  z0_i * z1_j
    y = jnp.dot(wa, diff, preferred_element_type=jnp.float32)
    y = y + jnp.dot(wm, mul, preferred_element_type=jnp.float32)
    return jnp.maximum(y + bias_b, 0.0)                   # (H, N1p), ReLU before BN


# ----------------------------------------------------------------------------
# Pass 1: per-(batch, row-tile) partial sum / sum-of-squares of ReLU(conv(.)).
# grid = (B, N0p/TI); both axes "parallel" (no cross-step accumulation).
# Padded rows/columns are masked out so the batch statistics are exact.
# ----------------------------------------------------------------------------
def _stats_kernel(z0t_ref, z1t_ref, wa_ref, wm_ref, bias_ref, sum_ref, sq_ref,
                  *, row_tile, n1p, h, n0_true, n1_true, needs_mask):
    at = z0t_ref[0, 0]                                    # (D, TI)
    ct = z1t_ref[0]                                       # (D, N1p)
    wa = wa_ref[...]                                      # (H, D)  pre-cast on host
    wm = wm_ref[...]                                      # (H, D)
    bias_b = jnp.broadcast_to(bias_ref[...], (h, n1p))    # hoisted broadcast

    if needs_mask:
        col_ok = (lax.broadcasted_iota(jnp.int32, (1, n1p), 1)
                  < n1_true).astype(jnp.float32)          # (1, N1p)
        base_row = pl.program_id(1) * row_tile

    s = jnp.zeros((h, 1), jnp.float32)
    q = jnp.zeros((h, 1), jnp.float32)
    for t in range(row_tile):                             # small bounded unroll (<=32)
        y = _row_activation(at, ct, wa, wm, bias_b, t)
        if needs_mask:
            row_ok = ((base_row + t) < n0_true).astype(jnp.float32)
            ym = y * (col_ok * row_ok)
        else:
            ym = y
        s = s + jnp.sum(ym, axis=1, keepdims=True)        # (H, 1)
        q = q + jnp.sum(ym * y, axis=1, keepdims=True)    # (H, 1)  (mask^2 == mask)

    sum_ref[0, 0] = s
    sq_ref[0, 0] = q


# ----------------------------------------------------------------------------
# Pass 2: recompute conv+ReLU, apply BatchNorm scale/shift, write NCHW output.
# Rows are handled in 8-row chunks: dense stores into a (8, H, N1p) scratch,
# then per-channel dense (8, N1p) aligned flushes into the (1, H, TI, N1p)
# output block -- no single-sublane masked stores.
# ----------------------------------------------------------------------------
def _apply_kernel(z0t_ref, z1t_ref, wa_ref, wm_ref, bias_ref, scale_ref, shift_ref,
                  out_ref, ybuf_ref, *, row_tile, n1p, h, out_dtype):
    at = z0t_ref[0, 0]                                    # (D, TI)
    ct = z1t_ref[0]                                       # (D, N1p)
    wa = wa_ref[...]
    wm = wm_ref[...]
    bias_b = jnp.broadcast_to(bias_ref[...], (h, n1p))    # hoisted broadcasts
    scale_b = jnp.broadcast_to(scale_ref[...], (h, n1p))
    shift_b = jnp.broadcast_to(shift_ref[...], (h, n1p))

    for c in range(row_tile // 8):                        # chunks of 8 rows
        for r in range(8):
            y = _row_activation(at, ct, wa, wm, bias_b, c * 8 + r)
            # dense leading-index store of the normalized row block
            ybuf_ref[r] = (y * scale_b + shift_b).astype(out_dtype)
        # flush chunk: one dense, sublane+lane aligned (8, N1p) store per channel
        for hh in range(h):
            out_ref[0, hh, c * 8:(c + 1) * 8, :] = ybuf_ref[:, hh, :]


def fully_connected_forward(z0, z1, w_hc, bias, gamma, beta, eps=1e-5,
                            matmul_dtype=jnp.float32, out_dtype=jnp.float32):
    """z0: (B, N0, D), z1: (B, N1, D); w_hc: (H, 2D) (squeezed 1x1 Conv2d weight);
    bias/gamma/beta: (H,).  Returns PyTorch-NCHW (B, H, N0, N1) in out_dtype.
    matmul_dtype=jnp.bfloat16 is recommended on v6e/v7x (f32 accumulation kept);
    out_dtype=jnp.bfloat16 halves the HBM-write-bound pass 2 if downstream allows.
    """
    B, N0, D = z0.shape
    B1, N1, D1 = z1.shape
    assert B1 == B and D1 == D
    H = w_hc.shape[0]
    assert w_hc.shape == (H, 2 * D)

    mm_bytes = jnp.dtype(matmul_dtype).itemsize
    out_bytes = jnp.dtype(out_dtype).itemsize

    n1p = _round_up(N1, 128)                    # lane-dense, unmasked stores
    row_tile = _pick_row_tile(N0, H, n1p, D, out_bytes, mm_bytes)
    n0p = _round_up(N0, row_tile)
    n_i = n0p // row_tile
    grid = (B, n_i)
    needs_mask = (n0p != N0) or (n1p != N1)

    # Host-side layout plumbing on the *small* inputs only (the big (B,H,N0,N1)
    # tensor is produced directly by the kernel in its final layout).
    z0p = jnp.pad(z0.astype(matmul_dtype), ((0, 0), (0, n0p - N0), (0, 0)))
    z1p = jnp.pad(z1.astype(matmul_dtype), ((0, 0), (0, n1p - N1), (0, 0)))
    z0_tiles = jnp.transpose(z0p.reshape(B, n_i, row_tile, D), (0, 1, 3, 2))  # (B,nI,D,TI)
    z1t = jnp.transpose(z1p, (0, 2, 1))                                       # (B,D,N1p)
    w_abs = w_hc[:, :D].astype(matmul_dtype)                                  # (H, D)
    w_mul = w_hc[:, D:].astype(matmul_dtype)                                  # (H, D)
    bias2 = bias.reshape(H, 1).astype(jnp.float32)                            # (H, 1)

    z0_spec = pl.BlockSpec((1, 1, D, row_tile), lambda b, i: (b, i, 0, 0))
    z1_spec = pl.BlockSpec((1, D, n1p), lambda b, i: (b, 0, 0))   # resident per b
    w_spec = pl.BlockSpec((H, D), lambda b, i: (0, 0))            # resident
    col_spec = pl.BlockSpec((H, 1), lambda b, i: (0, 0))          # resident
    stat_spec = pl.BlockSpec((1, 1, H, 1), lambda b, i: (b, i, 0, 0))

    mm_flops = 2 * B * n0p * n1p * H * (2 * D) + 4 * B * n0p * n1p * D
    in_bytes = (z0_tiles.size * mm_bytes + z1t.size * mm_bytes
                + 2 * H * D * mm_bytes + H * 4)
    cparams = pltpu.CompilerParams(
        dimension_semantics=("parallel", "parallel"),
        vmem_limit_bytes=40 * 1024 * 1024)

    # ---- Pass 1: batch statistics (per-(b,i) partials, no big intermediate) ----
    kernel1 = functools.partial(
        _stats_kernel, row_tile=row_tile, n1p=n1p, h=H,
        n0_true=N0, n1_true=N1, needs_mask=needs_mask)
    psum, psq = pl.pallas_call(
        kernel1,
        grid_spec=pltpu.PrefetchScalarGridSpec(
            num_scalar_prefetch=0,
            grid=grid,
            in_specs=[z0_spec, z1_spec, w_spec, w_spec, col_spec],
            out_specs=[stat_spec, stat_spec]),
        out_shape=(jax.ShapeDtypeStruct((B, n_i, H, 1), jnp.float32),
                   jax.ShapeDtypeStruct((B, n_i, H, 1), jnp.float32)),
        compiler_params=cparams,
        cost_estimate=pl.CostEstimate(
            flops=mm_flops, transcendentals=0,
            bytes_accessed=in_bytes + 2 * B * n_i * H * 4),
    )(z0_tiles, z1t, w_abs, w_mul, bias2)

    # ---- tiny per-channel glue math in plain JAX (f32) ----
    count = jnp.float32(B * N0 * N1)
    mean = jnp.sum(psum[:, :, :, 0], axis=(0, 1)) / count             # (H,)
    var = jnp.sum(psq[:, :, :, 0], axis=(0, 1)) / count - mean * mean # biased var
    var = jnp.maximum(var, 0.0)                                       # guard cancellation
    inv_std = lax.rsqrt(var + eps)
    gamma_f = gamma.astype(jnp.float32)
    scale = (gamma_f * inv_std).reshape(H, 1)                         # (H, 1)
    shift = (beta.astype(jnp.float32) - mean * gamma_f * inv_std).reshape(H, 1)

    # ---- Pass 2: recompute + normalize, write NCHW directly ----
    kernel2 = functools.partial(_apply_kernel, row_tile=row_tile, n1p=n1p, h=H,
                                out_dtype=out_dtype)
    out = pl.pallas_call(
        kernel2,
        grid_spec=pltpu.PrefetchScalarGridSpec(
            num_scalar_prefetch=0,
            grid=grid,
            in_specs=[z0_spec, z1_spec, w_spec, w_spec, col_spec, col_spec, col_spec],
            out_specs=pl.BlockSpec((1, H, row_tile, n1p), lambda b, i: (b, 0, i, 0)),
            scratch_shapes=[pltpu.VMEM((8, H, n1p), out_dtype)]),
        out_shape=jax.ShapeDtypeStruct((B, H, n0p, n1p), out_dtype),
        compiler_params=cparams,
        cost_estimate=pl.CostEstimate(
            flops=mm_flops, transcendentals=0,
            bytes_accessed=in_bytes + B * H * n0p * n1p * out_bytes),
    )(z0_tiles, z1t, w_abs, w_mul, bias2, scale, shift)

    if n0p != N0 or n1p != N1:
        out = out[:, :, :N0, :N1]   # crop padding (only copies when padding was added)
    return out


# ----------------------------------------------------------------------------
# Pure-JAX reference (mirrors the PyTorch forward exactly) for verification.
# ----------------------------------------------------------------------------
def reference_forward(z0, z1, w_hc, bias, gamma, beta, eps=1e-5):
    a = jnp.transpose(z0, (0, 2, 1))       # (B, D, N0)
    b = jnp.transpose(z1, (0, 2, 1))       # (B, D, N1)
    zd = jnp.abs(a[:, :, :, None] - b[:, :, None, :])
    zm = a[:, :, :, None] * b[:, :, None, :]
    zc = jnp.concatenate([zd, zm], axis=1)                         # (B, 2D, N0, N1)
    c = jnp.einsum('bcij,hc->bhij', zc, w_hc) + bias[None, :, None, None]
    c = jnp.maximum(c, 0.0)
    mean = c.mean(axis=(0, 2, 3))
    var = c.var(axis=(0, 2, 3))                                    # biased
    c = (c - mean[None, :, None, None]) * lax.rsqrt(var + eps)[None, :, None, None]
    return c * gamma[None, :, None, None] + beta[None, :, None, None]


if __name__ == "__main__":
    B, N0, N1, D, H = 2, 16, 16, 8, 32

    key = jax.random.PRNGKey(0)
    k0, k1, kw = jax.random.split(key, 3)

    z0 = jax.random.normal(k0, (B, N0, D), dtype=jnp.float32)
    z1 = jax.random.normal(k1, (B, N1, D), dtype=jnp.float32)

    # Conv2d(2D, H, 1): weight ~ N(0,1) (torch.nn.init.normal_), bias = 0
    w_hc = jax.random.normal(kw, (H, 2 * D), dtype=jnp.float32)    # squeezed (H,2D,1,1)
    bias = jnp.zeros((H,), dtype=jnp.float32)
    gamma = jnp.ones((H,), dtype=jnp.float32)                      # BatchNorm2d defaults
    beta = jnp.zeros((H,), dtype=jnp.float32)

    ref = reference_forward(z0, z1, w_hc, bias, gamma, beta)

    # f32 MXU path (strict check)
    out = jax.block_until_ready(
        fully_connected_forward(z0, z1, w_hc, bias, gamma, beta))
    assert out.shape == (B, H, N0, N1)
    np.testing.assert_allclose(np.asarray(out), np.asarray(ref), rtol=1e-4, atol=1e-4)

    # ragged shapes exercise padding / stats masking / output cropping
    N0b, N1b = 13, 19
    z0b = jax.random.normal(jax.random.PRNGKey(1), (B, N0b, D), dtype=jnp.float32)
    z1b = jax.random.normal(jax.random.PRNGKey(2), (B, N1b, D), dtype=jnp.float32)
    refb = reference_forward(z0b, z1b, w_hc, bias, gamma, beta)
    outb = jax.block_until_ready(
        fully_connected_forward(z0b, z1b, w_hc, bias, gamma, beta))
    assert outb.shape == (B, H, N0b, N1b)
    np.testing.assert_allclose(np.asarray(outb), np.asarray(refb), rtol=1e-4, atol=1e-4)

    # bf16 MXU + feature path (recommended on v6e / v7x) -- loose smoke check
    out_bf16 = jax.block_until_ready(
        fully_connected_forward(z0, z1, w_hc, bias, gamma, beta,
                                matmul_dtype=jnp.bfloat16))
    np.testing.assert_allclose(np.asarray(out_bf16), np.asarray(ref),
                               rtol=2.5e-1, atol=2.5e-1)

    print("KERNEL_OK")
</pallas_src>

<mosaic_0001>
module attributes {stable_mosaic.version = 11 : i64} {
  func.func @_stats_kernel(%arg0: i32, %arg1: i32, %arg2: memref<1x1x8x16xf32, #tpu.memory_space<vmem>>, %arg3: memref<1x8x128xf32, #tpu.memory_space<vmem>>, %arg4: memref<32x8xf32, #tpu.memory_space<vmem>>, %arg5: memref<32x8xf32, #tpu.memory_space<vmem>>, %arg6: memref<32x1xf32, #tpu.memory_space<vmem>>, %arg7: memref<1x1x32x1xf32, #tpu.memory_space<vmem>>, %arg8: memref<1x1x32x1xf32, #tpu.memory_space<vmem>>) attributes {dimension_semantics = [#tpu.dimension_semantics<parallel>, #tpu.dimension_semantics<parallel>], iteration_bounds = array<i64: 2, 1>, scalar_prefetch = 0 : i64, scratch_operands = 0 : i64, tpu.core_type = #tpu.core_type<tc>, window_params = [{transform_indices = @transform_0, window_bounds = array<i64: 1, 1, 8, 16>}, {transform_indices = @transform_1, window_bounds = array<i64: 1, 8, 128>}, {pipeline_mode = #tpu.pipeline_mode<synchronous>, transform_indices = @transform_2, window_bounds = array<i64: 32, 8>}, {pipeline_mode = #tpu.pipeline_mode<synchronous>, transform_indices = @transform_3, window_bounds = array<i64: 32, 8>}, {pipeline_mode = #tpu.pipeline_mode<synchronous>, transform_indices = @transform_4, window_bounds = array<i64: 32, 1>}, {transform_indices = @transform_5, window_bounds = array<i64: 1, 1, 32, 1>}, {transform_indices = @transform_6, window_bounds = array<i64: 1, 1, 32, 1>}]} {
    %c0 = arith.constant 0 : index
    %c0_0 = arith.constant 0 : index
    %c0_1 = arith.constant 0 : index
    %c0_2 = arith.constant 0 : index
    %0 = vector.load %arg2[%c0, %c0_0, %c0_1, %c0_2] : memref<1x1x8x16xf32, #tpu.memory_space<vmem>>, vector<1x1x8x16xf32>
    %1 = vector.shape_cast %0 : vector<1x1x8x16xf32> to vector<8x16xf32>
    %c0_3 = arith.constant 0 : index
    %c0_4 = arith.constant 0 : index
    %c0_5 = arith.constant 0 : index
    %2 = vector.load %arg3[%c0_3, %c0_4, %c0_5] : memref<1x8x128xf32, #tpu.memory_space<vmem>>, vector<1x8x128xf32>
    %3 = vector.shape_cast %2 : vector<1x8x128xf32> to vector<8x128xf32>
    %c0_6 = arith.constant 0 : index
    %c0_7 = arith.constant 0 : index
    %4 = vector.load %arg4[%c0_6, %c0_7] : memref<32x8xf32, #tpu.memory_space<vmem>>, vector<32x8xf32>
    %c0_8 = arith.constant 0 : index
    %c0_9 = arith.constant 0 : index
    %5 = vector.load %arg5[%c0_8, %c0_9] : memref<32x8xf32, #tpu.memory_space<vmem>>, vector<32x8xf32>
    %c0_10 = arith.constant 0 : index
    %c0_11 = arith.constant 0 : index
    %6 = vector.load %arg6[%c0_10, %c0_11] : memref<32x1xf32, #tpu.memory_space<vmem>>, vector<32x1xf32>
    %7 = vector.shape_cast %6 : vector<32x1xf32> to vector<32x1xf32>
    %8 = vector.broadcast %7 : vector<32x1xf32> to vector<32x128xf32>
    %9 = tpu.iota {dimensions = array<i32: 1>} : vector<1x128xi32>
    %c16_i32 = arith.constant 16 : i32
    %10 = vector.broadcast %c16_i32 : i32 to vector<1x128xi32>
    %11 = arith.cmpi slt, %9, %10 : vector<1x128xi32>
    %12 = arith.extui %11 : vector<1x128xi1> to vector<1x128xi32>
    %13 = arith.sitofp %12 : vector<1x128xi32> to vector<1x128xf32>
    %c16_i32_12 = arith.constant 16 : i32
    %14 = arith.muli %arg1, %c16_i32_12 : i32
    %cst = arith.constant 0.000000e+00 : f32
    %15 = vector.broadcast %cst : f32 to vector<32x1xf32>
    %cst_13 = arith.constant 0.000000e+00 : f32
    %16 = vector.broadcast %cst_13 : f32 to vector<32x1xf32>
    %17 = vector.extract_strided_slice %1 {offsets = [0, 0], sizes = [8, 1], strides = [1, 1]} : vector<8x16xf32> to vector<8x1xf32>
    %18 = vector.broadcast %17 : vector<8x1xf32> to vector<8x128xf32>
    %19 = arith.subf %18, %3 : vector<8x128xf32>
    %20 = math.absf %19 : vector<8x128xf32>
    %21 = vector.broadcast %17 : vector<8x1xf32> to vector<8x128xf32>
    %22 = arith.mulf %21, %3 : vector<8x128xf32>
    %cst_14 = arith.constant dense<0.000000e+00> : vector<32x128xf32>
    %23 = tpu.matmul %4, %20, %cst_14 {dimension_numbers = #tpu.dot_dimension_numbers<[1], [0], [0], [1], [0, 0, 1, 1], [], []>} : vector<32x8xf32>, vector<8x128xf32>, vector<32x128xf32> -> vector<32x128xf32>
    %cst_15 = arith.constant dense<0.000000e+00> : vector<32x128xf32>
    %24 = tpu.matmul %5, %22, %cst_15 {dimension_numbers = #tpu.dot_dimension_numbers<[1], [0], [0], [1], [0, 0, 1, 1], [], []>} : vector<32x8xf32>, vector<8x128xf32>, vector<32x128xf32> -> vector<32x128xf32>
    %25 = arith.addf %23, %24 : vector<32x128xf32>
    %26 = arith.addf %25, %8 : vector<32x128xf32>
    %cst_16 = arith.constant 0.000000e+00 : f32
    %27 = vector.broadcast %cst_16 : f32 to vector<32x128xf32>
    %28 = arith.maximumf %26, %27 : vector<32x128xf32>
    %c0_i32 = arith.constant 0 : i32
    %29 = arith.addi %14, %c0_i32 : i32
    %c16_i32_17 = arith.constant 16 : i32
    %30 = arith.cmpi slt, %29, %c16_i32_17 : i32
    %31 = arith.extui %30 : i1 to i32
    %32 = arith.sitofp %31 : i32 to f32
    %33 = vector.broadcast %32 : f32 to vector<1x128xf32>
    %34 = arith.mulf %13, %33 : vector<1x128xf32>
    %35 = vector.broadcast %34 : vector<1x128xf32> to vector<32x128xf32>
    %36 = arith.mulf %28, %35 : vector<32x128xf32>
    %cst_18 = arith.constant dense<0.000000e+00> : vector<32xf32>
    %37 = vector.multi_reduction <add>, %36, %cst_18 [1] : vector<32x128xf32> to vector<32xf32>
    %38 = vector.shape_cast %37 : vector<32xf32> to vector<32x1xf32>
    %39 = arith.addf %15, %38 : vector<32x1xf32>
    %40 = arith.mulf %36, %28 : vector<32x128xf32>
    %cst_19 = arith.constant dense<0.000000e+00> : vector<32xf32>
    %41 = vector.multi_reduction <add>, %40, %cst_19 [1] : vector<32x128xf32> to vector<32xf32>
    %42 = vector.shape_cast %41 : vector<32xf32> to vector<32x1xf32>
    %43 = arith.addf %16, %42 : vector<32x1xf32>
    %44 = vector.extract_strided_slice %1 {offsets = [0, 1], sizes = [8, 1], strides = [1, 1]} : vector<8x16xf32> to vector<8x1xf32>
    %45 = vector.broadcast %44 : vector<8x1xf32> to vector<8x128xf32>
    %46 = arith.subf %45, %3 : vector<8x128xf32>
    %47 = math.absf %46 : vector<8x128xf32>
    %48 = vector.broadcast %44 : vector<8x1xf32> to vector<8x128xf32>
    %49 = arith.mulf %48, %3 : vector<8x128xf32>
    %cst_20 = arith.constant dense<0.000000e+00> : vector<32x128xf32>
    %50 = tpu.matmul %4, %47, %cst_20 {dimension_numbers = #tpu.dot_dimension_numbers<[1], [0], [0], [1], [0, 0, 1, 1], [], []>} : vector<32x8xf32>, vector<8x128xf32>, vector<32x128xf32> -> vector<32x128xf32>
    %cst_21 = arith.constant dense<0.000000e+00> : vector<32x128xf32>
    %51 = tpu.matmul %5, %49, %cst_21 {dimension_numbers = #tpu.dot_dimension_numbers<[1], [0], [0], [1], [0, 0, 1, 1], [], []>} : vector<32x8xf32>, vector<8x128xf32>, vector<32x128xf32> -> vector<32x128xf32>
    %52 = arith.addf %50, %51 : vector<32x128xf32>
    %53 = arith.addf %52, %8 : vector<32x128xf32>
    %cst_22 = arith.constant 0.000000e+00 : f32
    %54 = vector.broadcast %cst_22 : f32 to vector<32x128xf32>
    %55 = arith.maximumf %53, %54 : vector<32x128xf32>
    %c1_i32 = arith.constant 1 : i32
    %56 = arith.addi %14, %c1_i32 : i32
    %c16_i32_23 = arith.constant 16 : i32
    %57 = arith.cmpi slt, %56, %c16_i32_23 : i32
    %58 = arith.extui %57 : i1 to i32
    %59 = arith.sitofp %58 : i32 to f32
    %60 = vector.broadcast %59 : f32 to vector<1x128xf32>
    %61 = arith.mulf %13, %60 : vector<1x128xf32>
    %62 = vector.broadcast %61 : vector<1x128xf32> to vector<32x128xf32>
    %63 = arith.mulf %55, %62 : vector<32x128xf32>
    %cst_24 = arith.constant dense<0.000000e+00> : vector<32xf32>
    %64 = vector.multi_reduction <add>, %63, %cst_24 [1] : vector<32x128xf32> to vector<32xf32>
    %65 = vector.shape_cast %64 : vector<32xf32> to vector<32x1xf32>
    %66 = arith.addf %39, %65 : vector<32x1xf32>
    %67 = arith.mulf %63, %55 : vector<32x128xf32>
    %cst_25 = arith.constant dense<0.000000e+00> : vector<32xf32>
    %68 = vector.multi_reduction <add>, %67, %cst_25 [1] : vector<32x128xf32> to vector<32xf32>
    %69 = vector.shape_cast %68 : vector<32xf32> to vector<32x1xf32>
    %70 = arith.addf %43, %69 : vector<32x1xf32>
    %71 = vector.extract_strided_slice %1 {offsets = [0, 2], sizes = [8, 1], strides = [1, 1]} : vector<8x16xf32> to vector<8x1xf32>
    %72 = vector.broadcast %71 : vector<8x1xf32> to vector<8x128xf32>
    %73 = arith.subf %72, %3 : vector<8x128xf32>
    %74 = math.absf %73 : vector<8x128xf32>
    %75 = vector.broadcast %71 : vector<8x1xf32> to vector<8x128xf32>
    %76 = arith.mulf %75, %3 : vector<8x128xf32>
    %cst_26 = arith.constant dense<0.000000e+00> : vector<32x128xf32>
    %77 = tpu.matmul %4, %74, %cst_26 {dimension_numbers = #tpu.dot_dimension_numbers<[1], [0], [0], [1], [0, 0, 1, 1], [], []>} : vector<32x8xf32>, vector<8x128xf32>, vector<32x128xf32> -> vector<32x128xf32>
    %cst_27 = arith.constant dense<0.000000e+00> : vector<32x128xf32>
    %78 = tpu.matmul %5, %76, %cst_27 {dimension_numbers = #tpu.dot_dimension_numbers<[1], [0], [0], [1], [0, 0, 1, 1], [], []>} : vector<32x8xf32>, vector<8x128xf32>, vector<32x128xf32> -> vector<32x128xf32>
    %79 = arith.addf %77, %78 : vector<32x128xf32>
    %80 = arith.addf %79, %8 : vector<32x128xf32>
    %cst_28 = arith.constant 0.000000e+00 : f32
    %81 = vector.broadcast %cst_28 : f32 to vector<32x128xf32>
    %82 = arith.maximumf %80, %81 : vector<32x128xf32>
    %c2_i32 = arith.constant 2 : i32
    %83 = arith.addi %14, %c2_i32 : i32
    %c16_i32_29 = arith.constant 16 : i32
    %84 = arith.cmpi slt, %83, %c16_i32_29 : i32
    %85 = arith.extui %84 : i1 to i32
    %86 = arith.sitofp %85 : i32 to f32
    %87 = vector.broadcast %86 : f32 to vector<1x128xf32>
    %88 = arith.mulf %13, %87 : vector<1x128xf32>
    %89 = vector.broadcast %88 : vector<1x128xf32> to vector<32x128xf32>
    %90 = arith.mulf %82, %89 : vector<32x128xf32>
    %cst_30 = arith.constant dense<0.000000e+00> : vector<32xf32>
    %91 = vector.multi_reduction <add>, %90, %cst_30 [1] : vector<32x128xf32> to vector<32xf32>
    %92 = vector.shape_cast %91 : vector<32xf32> to vector<32x1xf32>
    %93 = arith.addf %66, %92 : vector<32x1xf32>
    %94 = arith.mulf %90, %82 : vector<32x128xf32>
    %cst_31 = arith.constant dense<0.000000e+00> : vector<32xf32>
    %95 = vector.multi_reduction <add>, %94, %cst_31 [1] : vector<32x128xf32> to vector<32xf32>
    %96 = vector.shape_cast %95 : vector<32xf32> to vector<32x1xf32>
    %97 = arith.addf %70, %96 : vector<32x1xf32>
    %98 = vector.extract_strided_slice %1 {offsets = [0, 3], sizes = [8, 1], strides = [1, 1]} : vector<8x16xf32> to vector<8x1xf32>
    %99 = vector.broadcast %98 : vector<8x1xf32> to vector<8x128xf32>
    %100 = arith.subf %99, %3 : vector<8x128xf32>
    %101 = math.absf %100 : vector<8x128xf32>
    %102 = vector.broadcast %98 : vector<8x1xf32> to vector<8x128xf32>
    %103 = arith.mulf %102, %3 : vector<8x128xf32>
    %cst_32 = arith.constant dense<0.000000e+00> : vector<32x128xf32>
    %104 = tpu.matmul %4, %101, %cst_32 {dimension_numbers = #tpu.dot_dimension_numbers<[1], [0], [0], [1], [0, 0, 1, 1], [], []>} : vector<32x8xf32>, vector<8x128xf32>, vector<32x128xf32> -> vector<32x128xf32>
    %cst_33 = arith.constant dense<0.000000e+00> : vector<32x128xf32>
    %105 = tpu.matmul %5, %103, %cst_33 {dimension_numbers = #tpu.dot_dimension_numbers<[1], [0], [0], [1], [0, 0, 1, 1], [], []>} : vector<32x8xf32>, vector<8x128xf32>, vector<32x128xf32> -> vector<32x128xf32>
    %106 = arith.addf %104, %105 : vector<32x128xf32>
    %107 = arith.addf %106, %8 : vector<32x128xf32>
    %cst_34 = arith.constant 0.000000e+00 : f32
    %108 = vector.broadcast %cst_34 : f32 to vector<32x128xf32>
    %109 = arith.maximumf %107, %108 : vector<32x128xf32>
    %c3_i32 = arith.constant 3 : i32
    %110 = arith.addi %14, %c3_i32 : i32
    %c16_i32_35 = arith.constant 16 : i32
    %111 = arith.cmpi slt, %110, %c16_i32_35 : i32
    %112 = arith.extui %111 : i1 to i32
    %113 = arith.sitofp %112 : i32 to f32
    %114 = vector.broadcast %113 : f32 to vector<1x128xf32>
    %115 = arith.mulf %13, %114 : vector<1x128xf32>
    %116 = vector.broadcast %115 : vector<1x128xf32> to vector<32x128xf32>
    %117 = arith.mulf %109, %116 : vector<32x128xf32>
    %cst_36 = arith.constant dense<0.000000e+00> : vector<32xf32>
    %118 = vector.multi_reduction <add>, %117, %cst_36 [1] : vector<32x128xf32> to vector<32xf32>
    %119 = vector.shape_cast %118 : vector<32xf32> to vector<32x1xf32>
    %120 = arith.addf %93, %119 : vector<32x1xf32>
    %121 = arith.mulf %117, %109 : vector<32x128xf32>
    %cst_37 = arith.constant dense<0.000000e+00> : vector<32xf32>
    %122 = vector.multi_reduction <add>, %121, %cst_37 [1] : vector<32x128xf32> to vector<32xf32>
    %123 = vector.shape_cast %122 : vector<32xf32> to vector<32x1xf32>
    %124 = arith.addf %97, %123 : vector<32x1xf32>
    %125 = vector.extract_strided_slice %1 {offsets = [0, 4], sizes = [8, 1], strides = [1, 1]} : vector<8x16xf32> to vector<8x1xf32>
    %126 = vector.broadcast %125 : vector<8x1xf32> to vector<8x128xf32>
    %127 = arith.subf %126, %3 : vector<8x128xf32>
    %128 = math.absf %127 : vector<8x128xf32>
    %129 = vector.broadcast %125 : vector<8x1xf32> to vector<8x128xf32>
    %130 = arith.mulf %129, %3 : vector<8x128xf32>
    %cst_38 = arith.constant dense<0.000000e+00> : vector<32x128xf32>
    %131 = tpu.matmul %4, %128, %cst_38 {dimension_numbers = #tpu.dot_dimension_numbers<[1], [0], [0], [1], [0, 0, 1, 1], [], []>} : vector<32x8xf32>, vector<8x128xf32>, vector<32x128xf32> -> vector<32x128xf32>
    %cst_39 = arith.constant dense<0.000000e+00> : vector<32x128xf32>
    %132 = tpu.matmul %5, %130, %cst_39 {dimension_numbers = #tpu.dot_dimension_numbers<[1], [0], [0], [1], [0, 0, 1, 1], [], []>} : vector<32x8xf32>, vector<8x128xf32>, vector<32x128xf32> -> vector<32x128xf32>
    %133 = arith.addf %131, %132 : vector<32x128xf32>
    %134 = arith.addf %133, %8 : vector<32x128xf32>
    %cst_40 = arith.constant 0.000000e+00 : f32
    %135 = vector.broadcast %cst_40 : f32 to vector<32x128xf32>
    %136 = arith.maximumf %134, %135 : vector<32x128xf32>
    %c4_i32 = arith.constant 4 : i32
    %137 = arith.addi %14, %c4_i32 : i32
    %c16_i32_41 = arith.constant 16 : i32
    %138 = arith.cmpi slt, %137, %c16_i32_41 : i32
    %139 = arith.extui %138 : i1 to i32
    %140 = arith.sitofp %139 : i32 to f32
    %141 = vector.broadcast %140 : f32 to vector<1x128xf32>
    %142 = arith.mulf %13, %141 : vector<1x128xf32>
    %143 = vector.broadcast %142 : vector<1x128xf32> to vector<32x128xf32>
    %144 = arith.mulf %136, %143 : vector<32x128xf32>
    %cst_42 = arith.constant dense<0.000000e+00> : vector<32xf32>
    %145 = vector.multi_reduction <add>, %144, %cst_42 [1] : vector<32x128xf32> to vector<32xf32>
    %146 = vector.shape_cast %145 : vector<32xf32> to vector<32x1xf32>
    %147 = arith.addf %120, %146 : vector<32x1xf32>
    %148 = arith.mulf %144, %136 : vector<32x128xf32>
    %cst_43 = arith.constant dense<0.000000e+00> : vector<32xf32>
    %149 = vector.multi_reduction <add>, %148, %cst_43 [1] : vector<32x128xf32> to vector<32xf32>
    %150 = vector.shape_cast %149 : vector<32xf32> to vector<32x1xf32>
    %151 = arith.addf %124, %150 : vector<32x1xf32>
    %152 = vector.extract_strided_slice %1 {offsets = [0, 5], sizes = [8, 1], strides = [1, 1]} : vector<8x16xf32> to vector<8x1xf32>
    %153 = vector.broadcast %152 : vector<8x1xf32> to vector<8x128xf32>
    %154 = arith.subf %153, %3 : vector<8x128xf32>
    %155 = math.absf %154 : vector<8x128xf32>
    %156 = vector.broadcast %152 : vector<8x1xf32> to vector<8x128xf32>
    %157 = arith.mulf %156, %3 : vector<8x128xf32>
    %cst_44 = arith.constant dense<0.000000e+00> : vector<32x128xf32>
    %158 = tpu.matmul %4, %155, %cst_44 {dimension_numbers = #tpu.dot_dimension_numbers<[1], [0], [0], [1], [0, 0, 1, 1], [], []>} : vector<32x8xf32>, vector<8x128xf32>, vector<32x128xf32> -> vector<32x128xf32>
    %cst_45 = arith.constant dense<0.000000e+00> : vector<32x128xf32>
    %159 = tpu.matmul %5, %157, %cst_45 {dimension_numbers = #tpu.dot_dimension_numbers<[1], [0], [0], [1], [0, 0, 1, 1], [], []>} : vector<32x8xf32>, vector<8x128xf32>, vector<32x128xf32> -> vector<32x128xf32>
    %160 = arith.addf %158, %159 : vector<32x128xf32>
    %161 = arith.addf %160, %8 : vector<32x128xf32>
    %cst_46 = arith.constant 0.000000e+00 : f32
    %162 = vector.broadcast %cst_46 : f32 to vector<32x128xf32>
    %163 = arith.maximumf %161, %162 : vector<32x128xf32>
    %c5_i32 = arith.constant 5 : i32
    %164 = arith.addi %14, %c5_i32 : i32
    %c16_i32_47 = arith.constant 16 : i32
    %165 = arith.cmpi slt, %164, %c16_i32_47 : i32
    %166 = arith.extui %165 : i1 to i32
    %167 = arith.sitofp %166 : i32 to f32
    %168 = vector.broadcast %167 : f32 to vector<1x128xf32>
    %169 = arith.mulf %13, %168 : vector<1x128xf32>
    %170 = vector.broadcast %169 : vector<1x128xf32> to vector<32x128xf32>
    %171 = arith.mulf %163, %170 : vector<32x128xf32>
    %cst_48 = arith.constant dense<0.000000e+00> : vector<32xf32>
    %172 = vector.multi_reduction <add>, %171, %cst_48 [1] : vector<32x128xf32> to vector<32xf32>
    %173 = vector.shape_cast %172 : vector<32xf32> to vector<32x1xf32>
    %174 = arith.addf %147, %173 : vector<32x1xf32>
    %175 = arith.mulf %171, %163 : vector<32x128xf32>
    %cst_49 = arith.constant dense<0.000000e+00> : vector<32xf32>
    %176 = vector.multi_reduction <add>, %175, %cst_49 [1] : vector<32x128xf32> to vector<32xf32>
    %177 = vector.shape_cast %176 : vector<32xf32> to vector<32x1xf32>
    %178 = arith.addf %151, %177 : vector<32x1xf32>
    %179 = vector.extract_strided_slice %1 {offsets = [0, 6], sizes = [8, 1], strides = [1, 1]} : vector<8x16xf32> to vector<8x1xf32>
    %180 = vector.broadcast %179 : vector<8x1xf32> to vector<8x128xf32>
    %181 = arith.subf %180, %3 : vector<8x128xf32>
    %182 = math.absf %181 : vector<8x128xf32>
    %183 = vector.broadcast %179 : vector<8x1xf32> to vector<8x128xf32>
    %184 = arith.mulf %183, %3 : vector<8x128xf32>
    %cst_50 = arith.constant dense<0.000000e+00> : vector<32x128xf32>
    %185 = tpu.matmul %4, %182, %cst_50 {dimension_numbers = #tpu.dot_dimension_numbers<[1], [0], [0], [1], [0, 0, 1, 1], [], []>} : vector<32x8xf32>, vector<8x128xf32>, vector<32x128xf32> -> vector<32x128xf32>
    %cst_51 = arith.constant dense<0.000000e+00> : vector<32x128xf32>
    %186 = tpu.matmul %5, %184, %cst_51 {dimension_numbers = #tpu.dot_dimension_numbers<[1], [0], [0], [1], [0, 0, 1, 1], [], []>} : vector<32x8xf32>, vector<8x128xf32>, vector<32x128xf32> -> vector<32x128xf32>
    %187 = arith.addf %185, %186 : vector<32x128xf32>
    %188 = arith.addf %187, %8 : vector<32x128xf32>
    %cst_52 = arith.constant 0.000000e+00 : f32
    %189 = vector.broadcast %cst_52 : f32 to vector<32x128xf32>
    %190 = arith.maximumf %188, %189 : vector<32x128xf32>
    %c6_i32 = arith.constant 6 : i32
    %191 = arith.addi %14, %c6_i32 : i32
    %c16_i32_53 = arith.constant 16 : i32
    %192 = arith.cmpi slt, %191, %c16_i32_53 : i32
    %193 = arith.extui %192 : i1 to i32
    %194 = arith.sitofp %193 : i32 to f32
    %195 = vector.broadcast %194 : f32 to vector<1x128xf32>
    %196 = arith.mulf %13, %195 : vector<1x128xf32>
    %197 = vector.broadcast %196 : vector<1x128xf32> to vector<32x128xf32>
    %198 = arith.mulf %190, %197 : vector<32x128xf32>
    %cst_54 = arith.constant dense<0.000000e+00> : vector<32xf32>
    %199 = vector.multi_reduction <add>, %198, %cst_54 [1] : vector<32x128xf32> to vector<32xf32>
    %200 = vector.shape_cast %199 : vector<32xf32> to vector<32x1xf32>
    %201 = arith.addf %174, %200 : vector<32x1xf32>
    %202 = arith.mulf %198, %190 : vector<32x128xf32>
    %cst_55 = arith.constant dense<0.000000e+00> : vector<32xf32>
    %203 = vector.multi_reduction <add>, %202, %cst_55 [1] : vector<32x128xf32> to vector<32xf32>
    %204 = vector.shape_cast %203 : vector<32xf32> to vector<32x1xf32>
    %205 = arith.addf %178, %204 : vector<32x1xf32>
    %206 = vector.extract_strided_slice %1 {offsets = [0, 7], sizes = [8, 1], strides = [1, 1]} : vector<8x16xf32> to vector<8x1xf32>
    %207 = vector.broadcast %206 : vector<8x1xf32> to vector<8x128xf32>
    %208 = arith.subf %207, %3 : vector<8x128xf32>
    %209 = math.absf %208 : vector<8x128xf32>
    %210 = vector.broadcast %206 : vector<8x1xf32> to vector<8x128xf32>
    %211 = arith.mulf %210, %3 : vector<8x128xf32>
    %cst_56 = arith.constant dense<0.000000e+00> : vector<32x128xf32>
    %212 = tpu.matmul %4, %209, %cst_56 {dimension_numbers = #tpu.dot_dimension_numbers<[1], [0], [0], [1], [0, 0, 1, 1], [], []>} : vector<32x8xf32>, vector<8x128xf32>, vector<32x128xf32> -> vector<32x128xf32>
    %cst_57 = arith.constant dense<0.000000e+00> : vector<32x128xf32>
    %213 = tpu.matmul %5, %211, %cst_57 {dimension_numbers = #tpu.dot_dimension_numbers<[1], [0], [0], [1], [0, 0, 1, 1], [], []>} : vector<32x8xf32>, vector<8x128xf32>, vector<32x128xf32> -> vector<32x128xf32>
    %214 = arith.addf %212, %213 : vector<32x128xf32>
    %215 = arith.addf %214, %8 : vector<32x128xf32>
    %cst_58 = arith.constant 0.000000e+00 : f32
    %216 = vector.broadcast %cst_58 : f32 to vector<32x128xf32>
    %217 = arith.maximumf %215, %216 : vector<32x128xf32>
    %c7_i32 = arith.constant 7 : i32
    %218 = arith.addi %14, %c7_i32 : i32
    %c16_i32_59 = arith.constant 16 : i32
    %219 = arith.cmpi slt, %218, %c16_i32_59 : i32
    %220 = arith.extui %219 : i1 to i32
    %221 = arith.sitofp %220 : i32 to f32
    %222 = vector.broadcast %221 : f32 to vector<1x128xf32>
    %223 = arith.mulf %13, %222 : vector<1x128xf32>
    %224 = vector.broadcast %223 : vector<1x128xf32> to vector<32x128xf32>
    %225 = arith.mulf %217, %224 : vector<32x128xf32>
    %cst_60 = arith.constant dense<0.000000e+00> : vector<32xf32>
    %226 = vector.multi_reduction <add>, %225, %cst_60 [1] : vector<32x128xf32> to vector<32xf32>
    %227 = vector.shape_cast %226 : vector<32xf32> to vector<32x1xf32>
    %228 = arith.addf %201, %227 : vector<32x1xf32>
    %229 = arith.mulf %225, %217 : vector<32x128xf32>
    %cst_61 = arith.constant dense<0.000000e+00> : vector<32xf32>
    %230 = vector.multi_reduction <add>, %229, %cst_61 [1] : vector<32x128xf32> to vector<32xf32>
    %231 = vector.shape_cast %230 : vector<32xf32> to vector<32x1xf32>
    %232 = arith.addf %205, %231 : vector<32x1xf32>
    %233 = vector.extract_strided_slice %1 {offsets = [0, 8], sizes = [8, 1], strides = [1, 1]} : vector<8x16xf32> to vector<8x1xf32>
    %234 = vector.broadcast %233 : vector<8x1xf32> to vector<8x128xf32>
    %235 = arith.subf %234, %3 : vector<8x128xf32>
    %236 = math.absf %235 : vector<8x128xf32>
    %237 = vector.broadcast %233 : vector<8x1xf32> to vector<8x128xf32>
    %238 = arith.mulf %237, %3 : vector<8x128xf32>
    %cst_62 = arith.constant dense<0.000000e+00> : vector<32x128xf32>
    %239 = tpu.matmul %4, %236, %cst_62 {dimension_numbers = #tpu.dot_dimension_numbers<[1], [0], [0], [1], [0, 0, 1, 1], [], []>} : vector<32x8xf32>, vector<8x128xf32>, vector<32x128xf32> -> vector<32x128xf32>
    %cst_63 = arith.constant dense<0.000000e+00> : vector<32x128xf32>
    %240 = tpu.matmul %5, %238, %cst_63 {dimension_numbers = #tpu.dot_dimension_numbers<[1], [0], [0], [1], [0, 0, 1, 1], [], []>} : vector<32x8xf32>, vector<8x128xf32>, vector<32x128xf32> -> vector<32x128xf32>
    %241 = arith.addf %239, %240 : vector<32x128xf32>
    %242 = arith.addf %241, %8 : vector<32x128xf32>
    %cst_64 = arith.constant 0.000000e+00 : f32
    %243 = vector.broadcast %cst_64 : f32 to vector<32x128xf32>
    %244 = arith.maximumf %242, %243 : vector<32x128xf32>
    %c8_i32 = arith.constant 8 : i32
    %245 = arith.addi %14, %c8_i32 : i32
    %c16_i32_65 = arith.constant 16 : i32
    %246 = arith.cmpi slt, %245, %c16_i32_65 : i32
    %247 = arith.extui %246 : i1 to i32
    %248 = arith.sitofp %247 : i32 to f32
    %249 = vector.broadcast %248 : f32 to vector<1x128xf32>
    %250 = arith.mulf %13, %249 : vector<1x128xf32>
    %251 = vector.broadcast %250 : vector<1x128xf32> to vector<32x128xf32>
    %252 = arith.mulf %244, %251 : vector<32x128xf32>
    %cst_66 = arith.constant dense<0.000000e+00> : vector<32xf32>
    %253 = vector.multi_reduction <add>, %252, %cst_66 [1] : vector<32x128xf32> to vector<32xf32>
    %254 = vector.shape_cast %253 : vector<32xf32> to vector<32x1xf32>
    %255 = arith.addf %228, %254 : vector<32x1xf32>
    %256 = arith.mulf %252, %244 : vector<32x128xf32>
    %cst_67 = arith.constant dense<0.000000e+00> : vector<32xf32>
    %257 = vector.multi_reduction <add>, %256, %cst_67 [1] : vector<32x128xf32> to vector<32xf32>
    %258 = vector.shape_cast %257 : vector<32xf32> to vector<32x1xf32>
    %259 = arith.addf %232, %258 : vector<32x1xf32>
    %260 = vector.extract_strided_slice %1 {offsets = [0, 9], sizes = [8, 1], strides = [1, 1]} : vector<8x16xf32> to vector<8x1xf32>
    %261 = vector.broadcast %260 : vector<8x1xf32> to vector<8x128xf32>
    %262 = arith.subf %261, %3 : vector<8x128xf32>
    %263 = math.absf %262 : vector<8x128xf32>
    %264 = vector.broadcast %260 : vector<8x1xf32> to vector<8x128xf32>
    %265 = arith.mulf %264, %3 : vector<8x128xf32>
    %cst_68 = arith.constant dense<0.000000e+00> : vector<32x128xf32>
    %266 = tpu.matmul %4, %263, %cst_68 {dimension_numbers = #tpu.dot_dimension_numbers<[1], [0], [0], [1], [0, 0, 1, 1], [], []>} : vector<32x8xf32>, vector<8x128xf32>, vector<32x128xf32> -> vector<32x128xf32>
    %cst_69 = arith.constant dense<0.000000e+00> : vector<32x128xf32>
    %267 = tpu.matmul %5, %265, %cst_69 {dimension_numbers = #tpu.dot_dimension_numbers<[1], [0], [0], [1], [0, 0, 1, 1], [], []>} : vector<32x8xf32>, vector<8x128xf32>, vector<32x128xf32> -> vector<32x128xf32>
    %268 = arith.addf %266, %267 : vector<32x128xf32>
    %269 = arith.addf %268, %8 : vector<32x128xf32>
    %cst_70 = arith.constant 0.000000e+00 : f32
    %270 = vector.broadcast %cst_70 : f32 to vector<32x128xf32>
    %271 = arith.maximumf %269, %270 : vector<32x128xf32>
    %c9_i32 = arith.constant 9 : i32
    %272 = arith.addi %14, %c9_i32 : i32
    %c16_i32_71 = arith.constant 16 : i32
    %273 = arith.cmpi slt, %272, %c16_i32_71 : i32
    %274 = arith.extui %273 : i1 to i32
    %275 = arith.sitofp %274 : i32 to f32
    %276 = vector.broadcast %275 : f32 to vector<1x128xf32>
    %277 = arith.mulf %13, %276 : vector<1x128xf32>
    %278 = vector.broadcast %277 : vector<1x128xf32> to vector<32x128xf32>
    %279 = arith.mulf %271, %278 : vector<32x128xf32>
    %cst_72 = arith.constant dense<0.000000e+00> : vector<32xf32>
    %280 = vector.multi_reduction <add>, %279, %cst_72 [1] : vector<32x128xf32> to vector<32xf32>
    %281 = vector.shape_cast %280 : vector<32xf32> to vector<32x1xf32>
    %282 = arith.addf %255, %281 : vector<32x1xf32>
    %283 = arith.mulf %279, %271 : vector<32x128xf32>
    %cst_73 = arith.constant dense<0.000000e+00> : vector<32xf32>
    %284 = vector.multi_reduction <add>, %283, %cst_73 [1] : vector<32x128xf32> to vector<32xf32>
    %285 = vector.shape_cast %284 : vector<32xf32> to vector<32x1xf32>
    %286 = arith.addf %259, %285 : vector<32x1xf32>
    %287 = vector.extract_strided_slice %1 {offsets = [0, 10], sizes = [8, 1], strides = [1, 1]} : vector<8x16xf32> to vector<8x1xf32>
    %288 = vector.broadcast %287 : vector<8x1xf32> to vector<8x128xf32>
    %289 = arith.subf %288, %3 : vector<8x128xf32>
    %290 = math.absf %289 : vector<8x128xf32>
    %291 = vector.broadcast %287 : vector<8x1xf32> to vector<8x128xf32>
    %292 = arith.mulf %291, %3 : vector<8x128xf32>
    %cst_74 = arith.constant dense<0.000000e+00> : vector<32x128xf32>
    %293 = tpu.matmul %4, %290, %cst_74 {dimension_numbers = #tpu.dot_dimension_numbers<[1], [0], [0], [1], [0, 0, 1, 1], [], []>} : vector<32x8xf32>, vector<8x128xf32>, vector<32x128xf32> -> vector<32x128xf32>
    %cst_75 = arith.constant dense<0.000000e+00> : vector<32x128xf32>
    %294 = tpu.matmul %5, %292, %cst_75 {dimension_numbers = #tpu.dot_dimension_numbers<[1], [0], [0], [1], [0, 0, 1, 1], [], []>} : vector<32x8xf32>, vector<8x128xf32>, vector<32x128xf32> -> vector<32x128xf32>
    %295 = arith.addf %293, %294 : vector<32x128xf32>
    %296 = arith.addf %295, %8 : vector<32x128xf32>
    %cst_76 = arith.constant 0.000000e+00 : f32
    %297 = vector.broadcast %cst_76 : f32 to vector<32x128xf32>
    %298 = arith.maximumf %296, %297 : vector<32x128xf32>
    %c10_i32 = arith.constant 10 : i32
    %299 = arith.addi %14, %c10_i32 : i32
    %c16_i32_77 = arith.constant 16 : i32
    %300 = arith.cmpi slt, %299, %c16_i32_77 : i32
    %301 = arith.extui %300 : i1 to i32
    %302 = arith.sitofp %301 : i32 to f32
    %303 = vector.broadcast %302 : f32 to vector<1x128xf32>
    %304 = arith.mulf %13, %303 : vector<1x128xf32>
    %305 = vector.broadcast %304 : vector<1x128xf32> to vector<32x128xf32>
    %306 = arith.mulf %298, %305 : vector<32x128xf32>
    %cst_78 = arith.constant dense<0.000000e+00> : vector<32xf32>
    %307 = vector.multi_reduction <add>, %306, %cst_78 [1] : vector<32x128xf32> to vector<32xf32>
    %308 = vector.shape_cast %307 : vector<32xf32> to vector<32x1xf32>
    %309 = arith.addf %282, %308 : vector<32x1xf32>
    %310 = arith.mulf %306, %298 : vector<32x128xf32>
    %cst_79 = arith.constant dense<0.000000e+00> : vector<32xf32>
    %311 = vector.multi_reduction <add>, %310, %cst_79 [1] : vector<32x128xf32> to vector<32xf32>
    %312 = vector.shape_cast %311 : vector<32xf32> to vector<32x1xf32>
    %313 = arith.addf %286, %312 : vector<32x1xf32>
    %314 = vector.extract_strided_slice %1 {offsets = [0, 11], sizes = [8, 1], strides = [1, 1]} : vector<8x16xf32> to vector<8x1xf32>
    %315 = vector.broadcast %314 : vector<8x1xf32> to vector<8x128xf32>
    %316 = arith.subf %315, %3 : vector<8x128xf32>
    %317 = math.absf %316 : vector<8x128xf32>
    %318 = vector.broadcast %314 : vector<8x1xf32> to vector<8x128xf32>
    %319 = arith.mulf %318, %3 : vector<8x128xf32>
    %cst_80 = arith.constant dense<0.000000e+00> : vector<32x128xf32>
    %320 = tpu.matmul %4, %317, %cst_80 {dimension_numbers = #tpu.dot_dimension_numbers<[1], [0], [0], [1], [0, 0, 1, 1], [], []>} : vector<32x8xf32>, vector<8x128xf32>, vector<32x128xf32> -> vector<32x128xf32>
    %cst_81 = arith.constant dense<0.000000e+00> : vector<32x128xf32>
    %321 = tpu.matmul %5, %319, %cst_81 {dimension_numbers = #tpu.dot_dimension_numbers<[1], [0], [0], [1], [0, 0, 1, 1], [], []>} : vector<32x8xf32>, vector<8x128xf32>, vector<32x128xf32> -> vector<32x128xf32>
    %322 = arith.addf %320, %321 : vector<32x128xf32>
    %323 = arith.addf %322, %8 : vector<32x128xf32>
    %cst_82 = arith.constant 0.000000e+00 : f32
    %324 = vector.broadcast %cst_82 : f32 to vector<32x128xf32>
    %325 = arith.maximumf %323, %324 : vector<32x128xf32>
    %c11_i32 = arith.constant 11 : i32
    %326 = arith.addi %14, %c11_i32 : i32
    %c16_i32_83 = arith.constant 16 : i32
    %327 = arith.cmpi slt, %326, %c16_i32_83 : i32
    %328 = arith.extui %327 : i1 to i32
    %329 = arith.sitofp %328 : i32 to f32
    %330 = vector.broadcast %329 : f32 to vector<1x128xf32>
    %331 = arith.mulf %13, %330 : vector<1x128xf32>
    %332 = vector.broadcast %331 : vector<1x128xf32> to vector<32x128xf32>
    %333 = arith.mulf %325, %332 : vector<32x128xf32>
    %cst_84 = arith.constant dense<0.000000e+00> : vector<32xf32>
    %334 = vector.multi_reduction <add>, %333, %cst_84 [1] : vector<32x128xf32> to vector<32xf32>
    %335 = vector.shape_cast %334 : vector<32xf32> to vector<32x1xf32>
    %336 = arith.addf %309, %335 : vector<32x1xf32>
    %337 = arith.mulf %333, %325 : vector<32x128xf32>
    %cst_85 = arith.constant dense<0.000000e+00> : vector<32xf32>
    %338 = vector.multi_reduction <add>, %337, %cst_85 [1] : vector<32x128xf32> to vector<32xf32>
    %339 = vector.shape_cast %338 : vector<32xf32> to vector<32x1xf32>
    %340 = arith.addf %313, %339 : vector<32x1xf32>
    %341 = vector.extract_strided_slice %1 {offsets = [0, 12], sizes = [8, 1], strides = [1, 1]} : vector<8x16xf32> to vector<8x1xf32>
    %342 = vector.broadcast %341 : vector<8x1xf32> to vector<8x128xf32>
    %343 = arith.subf %342, %3 : vector<8x128xf32>
    %344 = math.absf %343 : vector<8x128xf32>
    %345 = vector.broadcast %341 : vector<8x1xf32> to vector<8x128xf32>
    %346 = arith.mulf %345, %3 : vector<8x128xf32>
    %cst_86 = arith.constant dense<0.000000e+00> : vector<32x128xf32>
    %347 = tpu.matmul %4, %344, %cst_86 {dimension_numbers = #tpu.dot_dimension_numbers<[1], [0], [0], [1], [0, 0, 1, 1], [], []>} : vector<32x8xf32>, vector<8x128xf32>, vector<32x128xf32> -> vector<32x128xf32>
    %cst_87 = arith.constant dense<0.000000e+00> : vector<32x128xf32>
    %348 = tpu.matmul %5, %346, %cst_87 {dimension_numbers = #tpu.dot_dimension_numbers<[1], [0], [0], [1], [0, 0, 1, 1], [], []>} : vector<32x8xf32>, vector<8x128xf32>, vector<32x128xf32> -> vector<32x128xf32>
    %349 = arith.addf %347, %348 : vector<32x128xf32>
    %350 = arith.addf %349, %8 : vector<32x128xf32>
    %cst_88 = arith.constant 0.000000e+00 : f32
    %351 = vector.broadcast %cst_88 : f32 to vector<32x128xf32>
    %352 = arith.maximumf %350, %351 : vector<32x128xf32>
    %c12_i32 = arith.constant 12 : i32
    %353 = arith.addi %14, %c12_i32 : i32
    %c16_i32_89 = arith.constant 16 : i32
    %354 = arith.cmpi slt, %353, %c16_i32_89 : i32
    %355 = arith.extui %354 : i1 to i32
    %356 = arith.sitofp %355 : i32 to f32
    %357 = vector.broadcast %356 : f32 to vector<1x128xf32>
    %358 = arith.mulf %13, %357 : vector<1x128xf32>
    %359 = vector.broadcast %358 : vector<1x128xf32> to vector<32x128xf32>
    %360 = arith.mulf %352, %359 : vector<32x128xf32>
    %cst_90 = arith.constant dense<0.000000e+00> : vector<32xf32>
    %361 = vector.multi_reduction <add>, %360, %cst_90 [1] : vector<32x128xf32> to vector<32xf32>
    %362 = vector.shape_cast %361 : vector<32xf32> to vector<32x1xf32>
    %363 = arith.addf %336, %362 : vector<32x1xf32>
    %364 = arith.mulf %360, %352 : vector<32x128xf32>
    %cst_91 = arith.constant dense<0.000000e+00> : vector<32xf32>
    %365 = vector.multi_reduction <add>, %364, %cst_91 [1] : vector<32x128xf32> to vector<32xf32>
    %366 = vector.shape_cast %365 : vector<32xf32> to vector<32x1xf32>
    %367 = arith.addf %340, %366 : vector<32x1xf32>
    %368 = vector.extract_strided_slice %1 {offsets = [0, 13], sizes = [8, 1], strides = [1, 1]} : vector<8x16xf32> to vector<8x1xf32>
    %369 = vector.broadcast %368 : vector<8x1xf32> to vector<8x128xf32>
    %370 = arith.subf %369, %3 : vector<8x128xf32>
    %371 = math.absf %370 : vector<8x128xf32>
    %372 = vector.broadcast %368 : vector<8x1xf32> to vector<8x128xf32>
    %373 = arith.mulf %372, %3 : vector<8x128xf32>
    %cst_92 = arith.constant dense<0.000000e+00> : vector<32x128xf32>
    %374 = tpu.matmul %4, %371, %cst_92 {dimension_numbers = #tpu.dot_dimension_numbers<[1], [0], [0], [1], [0, 0, 1, 1], [], []>} : vector<32x8xf32>, vector<8x128xf32>, vector<32x128xf32> -> vector<32x128xf32>
    %cst_93 = arith.constant dense<0.000000e+00> : vector<32x128xf32>
    %375 = tpu.matmul %5, %373, %cst_93 {dimension_numbers = #tpu.dot_dimension_numbers<[1], [0], [0], [1], [0, 0, 1, 1], [], []>} : vector<32x8xf32>, vector<8x128xf32>, vector<32x128xf32> -> vector<32x128xf32>
    %376 = arith.addf %374, %375 : vector<32x128xf32>
    %377 = arith.addf %376, %8 : vector<32x128xf32>
    %cst_94 = arith.constant 0.000000e+00 : f32
    %378 = vector.broadcast %cst_94 : f32 to vector<32x128xf32>
    %379 = arith.maximumf %377, %378 : vector<32x128xf32>
    %c13_i32 = arith.constant 13 : i32
    %380 = arith.addi %14, %c13_i32 : i32
    %c16_i32_95 = arith.constant 16 : i32
    %381 = arith.cmpi slt, %380, %c16_i32_95 : i32
    %382 = arith.extui %381 : i1 to i32
    %383 = arith.sitofp %382 : i32 to f32
    %384 = vector.broadcast %383 : f32 to vector<1x128xf32>
    %385 = arith.mulf %13, %384 : vector<1x128xf32>
    %386 = vector.broadcast %385 : vector<1x128xf32> to vector<32x128xf32>
    %387 = arith.mulf %379, %386 : vector<32x128xf32>
    %cst_96 = arith.constant dense<0.000000e+00> : vector<32xf32>
    %388 = vector.multi_reduction <add>, %387, %cst_96 [1] : vector<32x128xf32> to vector<32xf32>
    %389 = vector.shape_cast %388 : vector<32xf32> to vector<32x1xf32>
    %390 = arith.addf %363, %389 : vector<32x1xf32>
    %391 = arith.mulf %387, %379 : vector<32x128xf32>
    %cst_97 = arith.constant dense<0.000000e+00> : vector<32xf32>
    %392 = vector.multi_reduction <add>, %391, %cst_97 [1] : vector<32x128xf32> to vector<32xf32>
    %393 = vector.shape_cast %392 : vector<32xf32> to vector<32x1xf32>
    %394 = arith.addf %367, %393 : vector<32x1xf32>
    %395 = vector.extract_strided_slice %1 {offsets = [0, 14], sizes = [8, 1], strides = [1, 1]} : vector<8x16xf32> to vector<8x1xf32>
    %396 = vector.broadcast %395 : vector<8x1xf32> to vector<8x128xf32>
    %397 = arith.subf %396, %3 : vector<8x128xf32>
    %398 = math.absf %397 : vector<8x128xf32>
    %399 = vector.broadcast %395 : vector<8x1xf32> to vector<8x128xf32>
    %400 = arith.mulf %399, %3 : vector<8x128xf32>
    %cst_98 = arith.constant dense<0.000000e+00> : vector<32x128xf32>
    %401 = tpu.matmul %4, %398, %cst_98 {dimension_numbers = #tpu.dot_dimension_numbers<[1], [0], [0], [1], [0, 0, 1, 1], [], []>} : vector<32x8xf32>, vector<8x128xf32>, vector<32x128xf32> -> vector<32x128xf32>
    %cst_99 = arith.constant dense<0.000000e+00> : vector<32x128xf32>
    %402 = tpu.matmul %5, %400, %cst_99 {dimension_numbers = #tpu.dot_dimension_numbers<[1], [0], [0], [1], [0, 0, 1, 1], [], []>} : vector<32x8xf32>, vector<8x128xf32>, vector<32x128xf32> -> vector<32x128xf32>
    %403 = arith.addf %401, %402 : vector<32x128xf32>
    %404 = arith.addf %403, %8 : vector<32x128xf32>
    %cst_100 = arith.constant 0.000000e+00 : f32
    %405 = vector.broadcast %cst_100 : f32 to vector<32x128xf32>
    %406 = arith.maximumf %404, %405 : vector<32x128xf32>
    %c14_i32 = arith.constant 14 : i32
    %407 = arith.addi %14, %c14_i32 : i32
    %c16_i32_101 = arith.constant 16 : i32
    %408 = arith.cmpi slt, %407, %c16_i32_101 : i32
    %409 = arith.extui %408 : i1 to i32
    %410 = arith.sitofp %409 : i32 to f32
    %411 = vector.broadcast %410 : f32 to vector<1x128xf32>
    %412 = arith.mulf %13, %411 : vector<1x128xf32>
    %413 = vector.broadcast %412 : vector<1x128xf32> to vector<32x128xf32>
    %414 = arith.mulf %406, %413 : vector<32x128xf32>
    %cst_102 = arith.constant dense<0.000000e+00> : vector<32xf32>
    %415 = vector.multi_reduction <add>, %414, %cst_102 [1] : vector<32x128xf32> to vector<32xf32>
    %416 = vector.shape_cast %415 : vector<32xf32> to vector<32x1xf32>
    %417 = arith.addf %390, %416 : vector<32x1xf32>
    %418 = arith.mulf %414, %406 : vector<32x128xf32>
    %cst_103 = arith.constant dense<0.000000e+00> : vector<32xf32>
    %419 = vector.multi_reduction <add>, %418, %cst_103 [1] : vector<32x128xf32> to vector<32xf32>
    %420 = vector.shape_cast %419 : vector<32xf32> to vector<32x1xf32>
    %421 = arith.addf %394, %420 : vector<32x1xf32>
    %422 = vector.extract_strided_slice %1 {offsets = [0, 15], sizes = [8, 1], strides = [1, 1]} : vector<8x16xf32> to vector<8x1xf32>
    %423 = vector.broadcast %422 : vector<8x1xf32> to vector<8x128xf32>
    %424 = arith.subf %423, %3 : vector<8x128xf32>
    %425 = math.absf %424 : vector<8x128xf32>
    %426 = vector.broadcast %422 : vector<8x1xf32> to vector<8x128xf32>
    %427 = arith.mulf %426, %3 : vector<8x128xf32>
    %cst_104 = arith.constant dense<0.000000e+00> : vector<32x128xf32>
    %428 = tpu.matmul %4, %425, %cst_104 {dimension_numbers = #tpu.dot_dimension_numbers<[1], [0], [0], [1], [0, 0, 1, 1], [], []>} : vector<32x8xf32>, vector<8x128xf32>, vector<32x128xf32> -> vector<32x128xf32>
    %cst_105 = arith.constant dense<0.000000e+00> : vector<32x128xf32>
    %429 = tpu.matmul %5, %427, %cst_105 {dimension_numbers = #tpu.dot_dimension_numbers<[1], [0], [0], [1], [0, 0, 1, 1], [], []>} : vector<32x8xf32>, vector<8x128xf32>, vector<32x128xf32> -> vector<32x128xf32>
    %430 = arith.addf %428, %429 : vector<32x128xf32>
    %431 = arith.addf %430, %8 : vector<32x128xf32>
    %cst_106 = arith.constant 0.000000e+00 : f32
    %432 = vector.broadcast %cst_106 : f32 to vector<32x128xf32>
    %433 = arith.maximumf %431, %432 : vector<32x128xf32>
    %c15_i32 = arith.constant 15 : i32
    %434 = arith.addi %14, %c15_i32 : i32
    %c16_i32_107 = arith.constant 16 : i32
    %435 = arith.cmpi slt, %434, %c16_i32_107 : i32
    %436 = arith.extui %435 : i1 to i32
    %437 = arith.sitofp %436 : i32 to f32
    %438 = vector.broadcast %437 : f32 to vector<1x128xf32>
    %439 = arith.mulf %13, %438 : vector<1x128xf32>
    %440 = vector.broadcast %439 : vector<1x128xf32> to vector<32x128xf32>
    %441 = arith.mulf %433, %440 : vector<32x128xf32>
    %cst_108 = arith.constant dense<0.000000e+00> : vector<32xf32>
    %442 = vector.multi_reduction <add>, %441, %cst_108 [1] : vector<32x128xf32> to vector<32xf32>
    %443 = vector.shape_cast %442 : vector<32xf32> to vector<32x1xf32>
    %444 = arith.addf %417, %443 : vector<32x1xf32>
    %445 = arith.mulf %441, %433 : vector<32x128xf32>
    %cst_109 = arith.constant dense<0.000000e+00> : vector<32xf32>
    %446 = vector.multi_reduction <add>, %445, %cst_109 [1] : vector<32x128xf32> to vector<32xf32>
    %447 = vector.shape_cast %446 : vector<32xf32> to vector<32x1xf32>
    %448 = arith.addf %421, %447 : vector<32x1xf32>
    %c0_110 = arith.constant 0 : index
    %c0_111 = arith.constant 0 : index
    %c0_112 = arith.constant 0 : index
    %c0_113 = arith.constant 0 : index
    %449 = vector.load %arg7[%c0_110, %c0_111, %c0_112, %c0_113] : memref<1x1x32x1xf32, #tpu.memory_space<vmem>>, vector<1x1x32x1xf32>
    %450 = vector.shape_cast %449 : vector<1x1x32x1xf32> to vector<32x1xf32>
    %451 = vector.shape_cast %444 : vector<32x1xf32> to vector<1x1x32x1xf32>
    tpu.vector_store %arg7[%c0_110, %c0_111, %c0_112, %c0_113], %451 {strides = array<i32>} : memref<1x1x32x1xf32, #tpu.memory_space<vmem>>, vector<1x1x32x1xf32>,
    %c0_114 = arith.constant 0 : index
    %c0_115 = arith.constant 0 : index
    %c0_116 = arith.constant 0 : index
    %c0_117 = arith.constant 0 : index
    %452 = vector.load %arg8[%c0_114, %c0_115, %c0_116, %c0_117] : memref<1x1x32x1xf32, #tpu.memory_space<vmem>>, vector<1x1x32x1xf32>
    %453 = vector.shape_cast %452 : vector<1x1x32x1xf32> to vector<32x1xf32>
    %454 = vector.shape_cast %448 : vector<32x1xf32> to vector<1x1x32x1xf32>
    tpu.vector_store %arg8[%c0_114, %c0_115, %c0_116, %c0_117], %454 {strides = array<i32>} : memref<1x1x32x1xf32, #tpu.memory_space<vmem>>, vector<1x1x32x1xf32>,
    return
  }
  func.func @transform_0(%arg0: i32, %arg1: i32) -> (i32, i32, i32, i32) {
    %c0_i32 = arith.constant 0 : i32
    %c0_i32_0 = arith.constant 0 : i32
    %c0_i32_1 = arith.constant 0 : i32
    return %arg0, %arg1, %c0_i32, %c0_i32_0 : i32, i32, i32, i32
  }
  func.func @transform_1(%arg0: i32, %arg1: i32) -> (i32, i32, i32) {
    %c0_i32 = arith.constant 0 : i32
    %c0_i32_0 = arith.constant 0 : i32
    %c0_i32_1 = arith.constant 0 : i32
    return %arg0, %c0_i32, %c0_i32_0 : i32, i32, i32
  }
  func.func @transform_2(%arg0: i32, %arg1: i32) -> (i32, i32) {
    %c0_i32 = arith.constant 0 : i32
    %c0_i32_0 = arith.constant 0 : i32
    %c0_i32_1 = arith.constant 0 : i32
    return %c0_i32, %c0_i32_0 : i32, i32
  }
  func.func @transform_3(%arg0: i32, %arg1: i32) -> (i32, i32) {
    %c0_i32 = arith.constant 0 : i32
    %c0_i32_0 = arith.constant 0 : i32
    %c0_i32_1 = arith.constant 0 : i32
    return %c0_i32, %c0_i32_0 : i32, i32
  }
  func.func @transform_4(%arg0: i32, %arg1: i32) -> (i32, i32) {
    %c0_i32 = arith.constant 0 : i32
    %c0_i32_0 = arith.constant 0 : i32
    %c0_i32_1 = arith.constant 0 : i32
    return %c0_i32, %c0_i32_0 : i32, i32
  }
  func.func @transform_5(%arg0: i32, %arg1: i32) -> (i32, i32, i32, i32) {
    %c0_i32 = arith.constant 0 : i32
    %c0_i32_0 = arith.constant 0 : i32
    %c0_i32_1 = arith.constant 0 : i32
    return %arg0, %arg1, %c0_i32, %c0_i32_0 : i32, i32, i32, i32
  }
  func.func @transform_6(%arg0: i32, %arg1: i32) -> (i32, i32, i32, i32) {
    %c0_i32 = arith.constant 0 : i32
    %c0_i32_0 = arith.constant 0 : i32
    %c0_i32_1 = arith.constant 0 : i32
    return %arg0, %arg1, %c0_i32, %c0_i32_0 : i32, i32, i32, i32
  }
}

</mosaic_0001>

<bundles_post_ra>
// kernel: tpu_custom_call.1
= control target key start
LH: loop header
LB: loop body
LE: loop exit
PB: predicated region body
PF: predicated region fallthrough
CT: control target
= control target key end

     0   :  { %s4819_s21 = smov 0   ;;  %s4821_s22 = smov 0   ;;  %s5692_s0 = inlined_call_operand.vmem [shape: f32[2,1,8,16], index: 0, kind: input, shape index: {}]   ;;  %s5693_s1 = inlined_call_operand.vmem [shape: f32[2,8,128], index: 1, kind: input, shape index: {}]   ;;  %s5694_s2 = inlined_call_operand.vmem [shape: f32[32,8], index: 2, kind: input, shape index: {}]   ;;  %s5695_s3 = inlined_call_operand.vmem [shape: f32[32,8], index: 3, kind: input, shape index: {}]   ;;  %s5696_s4 = inlined_call_operand.vmem [shape: f32[32,1], index: 4, kind: input, shape index: {}]   ;;  %s5697_s5 = inlined_call_operand.vmem [shape: f32[2,1,32,1], index: 5, kind: output, shape index: {0}]   ;;  %s5698_s6 = inlined_call_operand.vmem [shape: f32[2,1,32,1], index: 6, kind: output, shape index: {1}]  }
   0x1   :  { %s4823_s23 = smov 0  }
   0x2 LB: > { %s29_s24 = sadd.s32 1, %s4761_s22  ;;  %p4119_p0 = scmp.ge.s32.totalorder %s4765_s23, 1  ;;  %s4765_s23 = sphi %s4823_s23, %s17_s23   ;;  %s4761_s22 = sphi %s4821_s22, %s5700_s22   ;;  %s4757_s21 = sphi %s4819_s21, %s5699_s21  }
   0x3   : > { %p31_p1 = scmp.ge.s32.totalorder %s29_s24, 2  ;;  %p244_p2 = scmp.lt.s32.totalorder %s4765_s23, 3 }
   0x5   : > { %s5702_s24 = smov (%p31_p1, %s29_s24), 0  ;;  %p245_p3 = pnand %p4119_p0, %p244_p2 }
   0x6   : > { %p293_p4 = scmp.lt.s32.totalorder (!%p245_p3), %s4757_s21, 1 }
   0x7   : > { %248 = sbr.rel (%p245_p3) target bundleno = 1362 (0x552), region = 40 }
   0xc   : > { %v332_v0 = vld [vmem:[%s5696_s4] sm:$0xff]  ;;  %v334_v1 = vld [vmem:[%s5696_s4 + $0x10] sm:$0xff]  ;;  %v4767_v2 = vmov 0   ;;  %s5704_s21 = smov (!%p293_p4, %s4757_s21), 1  ;;  %v333_v3 = vld [vmem:[%s5696_s4 + $0x8] sm:$0xff]  ;;  %vm370_vm0 = vcmask 64512   ;;  %v356_v58 = vlaneseq }
   0xd   : > { %4716 = vset.pattern.permute.xlu0 %v4767_v2  ;;  %4717 = vset.pattern.permute.xlu1 %v4767_v2  ;;  %v335_v4 = vld [vmem:[%s5696_s4 + $0x18] sm:$0xff]  ;;  %s4120_s9 = sshll.u32 %s5704_s21, 3  ;;  %v4865_v6 = vld [vmem:[%s5695_s3] sm:$0xff]  ;;  %v4768_v7 = vmov 2   ;;  %v4769_v9 = vmov 1   ;;  %v4770_v10 = vmov 4  }
   0xe   : > { %338 = vperm.xlu0 %4716, %v332_v0   ;;  %348 = vperm.xlu1 %4717, %v334_v1   ;;  %s4857_s12 = scalar_lea.vmem %s5692_s0, %s4120_s9  ;;  %v4873_v8 = vld [vmem:[%s5694_s2] sm:$0xff]  ;;  %v4771_v11 = vmov 3   ;;  %v4772_v12 = vmov 5   ;;  %v4773_v13 = vmov 6   ;;  %v4774_v14 = vmov 7   ;;  %s4893_s19 = scalar_lea.vmem %s5693_s1, %s4120_s9  ;;  %v4907_v23 = vld [vmem:[%s5695_s3 + $0x8] sm:$0xff] }
   0xf   : > { %v4860_v5 = vld [vmem:[%s4857_s12] sm:$0xff]  ;;  %4421 = vmatprep.mubr.msk.f32.mxu0 %vm370_vm0, %v4865_v6  ;;  %4429 = vmatprep.mubr.msk.f32.mxu1 %vm370_vm0, %v4873_v8  ;;  %v4912_v25 = vld [vmem:[%s5695_s3 + $0x10] sm:$0xff]  ;;  %v4917_v26 = vld [vmem:[%s5694_s2 + $0x8] sm:$0xff]  ;;  %v357_v59 = vand.u32 127, %v356_v58  ;;  %vm3955_vm2 = vcmask 7168  }
  0x10   : > { %v4898_v18 = vld [vmem:[%s4893_s19] sm:$0xff]  ;;  %v4924_v29 = vld [vmem:[%s5694_s2 + $0x10] sm:$0xff]  ;;  %v4933_v32 = vld [vmem:[%s5695_s3 + $0x18] sm:$0xff] }
  0x11   : > { %v4943_v34 = vld [vmem:[%s5694_s2 + $0x18] sm:$0xff]  ;;  %vm358_vm1 = vcmp.lt.s32.totalorder %v357_v59, 16 }
  0x12   : > { %343 = vperm.xlu0 %4716, %v333_v3   ;;  %353 = vperm.xlu1 %4717, %v335_v4  }
  0x16   : > { %364 = vperm.xlu0 %4716, %v4860_v5   ;;  %4719 = vset.pattern.permute.xlu1 %v4768_v7  ;;  %v4775_v7 = vmov 0.0  }
  0x17   : > { %834 = vperm.xlu1 %4719, %v4860_v5  }
  0x1a   : > { %4718 = vset.pattern.permute.xlu0 %v4769_v9  ;;  %v5077_v9 = vsel %vm358_vm1, 1.0, %v4775_v7 }
  0x1b   : > { %611 = vperm.xlu0 %4718, %v4860_v5   ;;  %4721 = vset.pattern.permute.xlu1 %v4770_v10 }
  0x1c   : > { %1280 = vperm.xlu1 %4721, %v4860_v5  }
  0x1f   : > { %4720 = vset.pattern.permute.xlu0 %v4771_v11 }
  0x20   : > { %1057 = vperm.xlu0 %4720, %v4860_v5   ;;  %4722 = vset.pattern.permute.xlu1 %v4772_v12 }
  0x21   : > { %1503 = vperm.xlu1 %4722, %v4860_v5  }
  0x24   : > { %4723 = vset.pattern.permute.xlu0 %v4773_v13 }
  0x25   : > { %1726 = vperm.xlu0 %4723, %v4860_v5   ;;  %4724 = vset.pattern.permute.xlu1 %v4774_v14 }
  0x26   : > { %1949 = vperm.xlu1 %4724, %v4860_v5  }
  0x89   : > { %v4884_v15 = vpop.permute.xlu0 %338  ;;  %v4886_v16 = vpop.permute.xlu1 %348 }
  0x8d   : > { %v4895_v17 = vpop.permute.xlu0 %343  ;;  %v4900_v20 = vpop.permute.xlu1 %353 }
  0x91   : > { %v365_v19 = vpop.permute.xlu0 %364 }
  0x92   : > { %v369_v21 = vmul.f32 %v365_v19, %v4898_v18  ;;  %v367_v22 = vsub.f32 %v365_v19, %v4898_v18  ;;  %v835_v27 = vpop.permute.xlu1 %834 }
  0x93   : > { %v837_v33 = vsub.f32 %v835_v27, %v4898_v18  ;;  %v839_v36 = vmul.f32 %v835_v27, %v4898_v18 }
  0x94   : > { %4419 = vmatprep.subr.mxu0 %v369_v21  ;;  %v368_v24 = vand.u32 2147483647, %v367_v22 }
  0x95   : > { %4420 = vmatpush3.msra.mxu0 %v369_v21  ;;  %v838_v38 = vand.u32 2147483647, %v837_v33 }
  0x96   : > { %4422 = vmatmul.mubr.msk.f32.vlgmr.msra.gmra.mxu0 %vm370_vm0, %v4907_v23  ;;  %4427 = vmatprep.subr.mxu1 %v368_v24  ;;  %v612_v28 = vpop.permute.xlu0 %611 }
  0x97   : > { %4428 = vmatpush3.msra.mxu1 %v368_v24  ;;  %v614_v30 = vsub.f32 %v612_v28, %v4898_v18  ;;  %v616_v31 = vmul.f32 %v612_v28, %v4898_v18  ;;  %4424 = vmatprep.mubr.msk.f32.mxu0 %vm370_vm0, %v4912_v25  ;;  %v1281_v42 = vpop.permute.xlu1 %1280 }
  0x98   : > { %4430 = vmatmul.mubr.msk.f32.vlgmr.msra.gmra.mxu1 %vm370_vm0, %v4917_v26  ;;  %v1283_v43 = vsub.f32 %v1281_v42, %v4898_v18  ;;  %v1285_v44 = vmul.f32 %v1281_v42, %v4898_v18 }
  0x99   : > { %4432 = vmatprep.mubr.msk.f32.mxu1 %vm370_vm0, %v4924_v29  ;;  %4435 = vmatprep.subr.mxu0 %v616_v31  ;;  %v615_v35 = vand.u32 2147483647, %v614_v30 }
  0x9a   : > { %4425 = vmatmul.mubr.msk.f32.gmra.mxu0 %vm370_vm0, %v4933_v32  ;;  %v1284_v45 = vand.u32 2147483647, %v1283_v43 }
  0x9b   : > { %4436 = vmatpush3.msra.mxu0 %v616_v31  ;;  %4437 = vmatprep.mubr.msk.f32.mxu0 %vm370_vm0, %v4865_v6  ;;  %v1058_v37 = vpop.permute.xlu0 %1057 }
  0x9c   : > { %4433 = vmatmul.mubr.msk.f32.gmra.mxu1 %vm370_vm0, %v4943_v34  ;;  %4443 = vmatprep.subr.mxu1 %v615_v35  ;;  %v1060_v39 = vsub.f32 %v1058_v37, %v4898_v18  ;;  %v1062_v40 = vmul.f32 %v1058_v37, %v4898_v18  ;;  %v1504_v46 = vpop.permute.xlu1 %1503 }
  0x9d   : > { %4444 = vmatpush3.msra.mxu1 %v615_v35  ;;  %4445 = vmatprep.mubr.msk.f32.mxu1 %vm370_vm0, %v4873_v8  ;;  %v1506_v47 = vsub.f32 %v1504_v46, %v4898_v18  ;;  %v1508_v48 = vmul.f32 %v1504_v46, %v4898_v18 }
  0x9e   : > { %4438 = vmatmul.mubr.msk.f32.vlgmr.msra.gmra.mxu0 %vm370_vm0, %v4907_v23  ;;  %4451 = vmatprep.subr.mxu0 %v839_v36  ;;  %v1061_v41 = vand.u32 2147483647, %v1060_v39 }
  0x9f   : > { %4440 = vmatprep.mubr.msk.f32.mxu0 %vm370_vm0, %v4912_v25  ;;  %4452 = vmatpush3.msra.mxu0 %v839_v36  ;;  %v1507_v49 = vand.u32 2147483647, %v1506_v47  ;;  %v4776_v47 = vmov 8  }
  0xa0   : > { %4446 = vmatmul.mubr.msk.f32.vlgmr.msra.gmra.mxu1 %vm370_vm0, %v4917_v26  ;;  %4459 = vmatprep.subr.mxu1 %v838_v38  ;;  %v1727_v50 = vpop.permute.xlu0 %1726 }
  0xa1   : > { %4448 = vmatprep.mubr.msk.f32.mxu1 %vm370_vm0, %v4924_v29  ;;  %4460 = vmatpush3.msra.mxu1 %v838_v38  ;;  %v1729_v51 = vsub.f32 %v1727_v50, %v4898_v18  ;;  %v1731_v52 = vmul.f32 %v1727_v50, %v4898_v18  ;;  %v1950_v54 = vpop.permute.xlu1 %1949 }
  0xa2   : > { %4441 = vmatmul.mubr.msk.f32.gmra.mxu0 %vm370_vm0, %v4933_v32  ;;  %4467 = vmatprep.subr.mxu0 %v1062_v40  ;;  %v1952_v55 = vsub.f32 %v1950_v54, %v4898_v18  ;;  %v1954_v56 = vmul.f32 %v1950_v54, %v4898_v18 }
  0xa3   : > { %4453 = vmatprep.mubr.msk.f32.mxu0 %vm370_vm0, %v4865_v6  ;;  %4475 = vmatprep.subr.mxu1 %v1061_v41  ;;  %v1730_v53 = vand.u32 2147483647, %v1729_v51 }
  0xa4   : > { %4449 = vmatmul.mubr.msk.f32.gmra.mxu1 %vm370_vm0, %v4943_v34  ;;  %v1953_v57 = vand.u32 2147483647, %v1952_v55  ;;  %4725 = vset.pattern.permute.xlu0 %v4776_v47 }
  0xa5   : > { %4461 = vmatprep.mubr.msk.f32.mxu1 %vm370_vm0, %v4873_v8 }
  0xa6   : > { %4454 = vmatmul.mubr.msk.f32.vlgmr.msra.gmra.mxu0 %vm370_vm0, %v4907_v23 }
  0xa7   : > { %4456 = vmatprep.mubr.msk.f32.mxu0 %vm370_vm0, %v4912_v25  ;;  %4468 = vmatpush3.msra.mxu0 %v1062_v40 }
  0xa8   : > { %4462 = vmatmul.mubr.msk.f32.vlgmr.msra.gmra.mxu1 %vm370_vm0, %v4917_v26  ;;  %4483 = vmatprep.subr.mxu0 %v1285_v44 }
  0xa9   : > { %4464 = vmatprep.mubr.msk.f32.mxu1 %vm370_vm0, %v4924_v29  ;;  %4476 = vmatpush3.msra.mxu1 %v1061_v41 }
  0xaa   : > { %4457 = vmatmul.mubr.msk.f32.gmra.mxu0 %vm370_vm0, %v4933_v32  ;;  %4491 = vmatprep.subr.mxu1 %v1284_v45 }
  0xab   : > { %4469 = vmatprep.mubr.msk.f32.mxu0 %vm370_vm0, %v4865_v6 }
  0xac   : > { %4465 = vmatmul.mubr.msk.f32.gmra.mxu1 %vm370_vm0, %v4943_v34 }
  0xad   : > { %4477 = vmatprep.mubr.msk.f32.mxu1 %vm370_vm0, %v4873_v8 }
  0xae   : > { %4470 = vmatmul.mubr.msk.f32.vlgmr.msra.gmra.mxu0 %vm370_vm0, %v4907_v23 }
  0xaf   : > { %4472 = vmatprep.mubr.msk.f32.mxu0 %vm370_vm0, %v4912_v25  ;;  %4484 = vmatpush3.msra.mxu0 %v1285_v44 }
  0xb0   : > { %4478 = vmatmul.mubr.msk.f32.vlgmr.msra.gmra.mxu1 %vm370_vm0, %v4917_v26  ;;  %4499 = vmatprep.subr.mxu0 %v1508_v48 }
  0xb1   : > { %4480 = vmatprep.mubr.msk.f32.mxu1 %vm370_vm0, %v4924_v29  ;;  %4492 = vmatpush3.msra.mxu1 %v1284_v45 }
  0xb2   : > { %4473 = vmatmul.mubr.msk.f32.gmra.mxu0 %vm370_vm0, %v4933_v32  ;;  %4507 = vmatprep.subr.mxu1 %v1507_v49 }
  0xb3   : > { %4485 = vmatprep.mubr.msk.f32.mxu0 %vm370_vm0, %v4865_v6 }
  0xb4   : > { %4481 = vmatmul.mubr.msk.f32.gmra.mxu1 %vm370_vm0, %v4943_v34 }
  0xb5   : > { %4493 = vmatprep.mubr.msk.f32.mxu1 %vm370_vm0, %v4873_v8 }
  0xb6   : > { %4486 = vmatmul.mubr.msk.f32.vlgmr.msra.gmra.mxu0 %vm370_vm0, %v4907_v23 }
  0xb7   : > { %4488 = vmatprep.mubr.msk.f32.mxu0 %vm370_vm0, %v4912_v25  ;;  %4500 = vmatpush3.msra.mxu0 %v1508_v48 }
  0xb8   : > { %4494 = vmatmul.mubr.msk.f32.vlgmr.msra.gmra.mxu1 %vm370_vm0, %v4917_v26  ;;  %4515 = vmatprep.subr.mxu0 %v1731_v52 }
  0xb9   : > { %4496 = vmatprep.mubr.msk.f32.mxu1 %vm370_vm0, %v4924_v29  ;;  %4508 = vmatpush3.msra.mxu1 %v1507_v49 }
  0xba   : > { %4489 = vmatmul.mubr.msk.f32.gmra.mxu0 %vm370_vm0, %v4933_v32  ;;  %4523 = vmatprep.subr.mxu1 %v1730_v53 }
  0xbb   : > { %4501 = vmatprep.mubr.msk.f32.mxu0 %vm370_vm0, %v4865_v6 }
  0xbc   : > { %4497 = vmatmul.mubr.msk.f32.gmra.mxu1 %vm370_vm0, %v4943_v34 }
  0xbd   : > { %4509 = vmatprep.mubr.msk.f32.mxu1 %vm370_vm0, %v4873_v8 }
  0xbe   : > { %4502 = vmatmul.mubr.msk.f32.vlgmr.msra.gmra.mxu0 %vm370_vm0, %v4907_v23 }
  0xbf   : > { %4504 = vmatprep.mubr.msk.f32.mxu0 %vm370_vm0, %v4912_v25  ;;  %4516 = vmatpush3.msra.mxu0 %v1731_v52 }
  0xc0   : > { %4510 = vmatmul.mubr.msk.f32.vlgmr.msra.gmra.mxu1 %vm370_vm0, %v4917_v26  ;;  %4531 = vmatprep.subr.mxu0 %v1954_v56 }
  0xc1   : > { %4512 = vmatprep.mubr.msk.f32.mxu1 %vm370_vm0, %v4924_v29  ;;  %4524 = vmatpush3.msra.mxu1 %v1730_v53 }
  0xc2   : > { %4505 = vmatmul.mubr.msk.f32.gmra.mxu0 %vm370_vm0, %v4933_v32  ;;  %4539 = vmatprep.subr.mxu1 %v1953_v57 }
  0xc3   : > { %4517 = vmatprep.mubr.msk.f32.mxu0 %vm370_vm0, %v4865_v6 }
  0xc4   : > { %4513 = vmatmul.mubr.msk.f32.gmra.mxu1 %vm370_vm0, %v4943_v34 }
  0xc5   : > { %4525 = vmatprep.mubr.msk.f32.mxu1 %vm370_vm0, %v4873_v8 }
  0xc6   : > { %4518 = vmatmul.mubr.msk.f32.vlgmr.msra.gmra.mxu0 %vm370_vm0, %v4907_v23 }
  0xc7   : > { %4520 = vmatprep.mubr.msk.f32.mxu0 %vm370_vm0, %v4912_v25  ;;  %4532 = vmatpush3.msra.mxu0 %v1954_v56 }
  0xc8   : > { %4526 = vmatmul.mubr.msk.f32.vlgmr.msra.gmra.mxu1 %vm370_vm0, %v4917_v26 }
  0xc9   : > { %4528 = vmatprep.mubr.msk.f32.mxu1 %vm370_vm0, %v4924_v29  ;;  %4540 = vmatpush3.msra.mxu1 %v1953_v57 }
  0xca   : > { %4521 = vmatmul.mubr.msk.f32.gmra.mxu0 %vm370_vm0, %v4933_v32 }
  0xcb   : > { %4533 = vmatprep.mubr.msk.f32.mxu0 %vm370_vm0, %v4865_v6 }
  0xcc   : > { %4529 = vmatmul.mubr.msk.f32.gmra.mxu1 %vm370_vm0, %v4943_v34 }
  0xcd   : > { %4541 = vmatprep.mubr.msk.f32.mxu1 %vm370_vm0, %v4873_v8 }
  0xce   : > { %4534 = vmatmul.mubr.msk.f32.vlgmr.msra.gmra.mxu0 %vm370_vm0, %v4907_v23 }
  0xcf   : > { %4536 = vmatprep.mubr.msk.f32.mxu0 %vm370_vm0, %v4912_v25 }
  0xd0   : > { %4542 = vmatmul.mubr.msk.f32.vlgmr.msra.gmra.mxu1 %vm370_vm0, %v4917_v26 }
  0xd1   : > { %4544 = vmatprep.mubr.msk.f32.mxu1 %vm370_vm0, %v4924_v29 }
  0xd2   : > { %4537 = vmatmul.mubr.msk.f32.gmra.mxu0 %vm370_vm0, %v4933_v32 }
  0xd3   : > { %4549 = vmatprep.mubr.msk.f32.mxu0 %vm370_vm0, %v4865_v6 }
  0xd4   : > { %4545 = vmatmul.mubr.msk.f32.gmra.mxu1 %vm370_vm0, %v4943_v34 }
  0xd5   : > { %4557 = vmatprep.mubr.msk.f32.mxu1 %vm370_vm0, %v4873_v8 }
 0x156   : > { %v4423_v60 = vpop.f32.mrf.mxu0 }
 0x158   : > { %v449_v61 = vpop.f32.mrf.mxu0  ;;  %v4431_v62 = vpop.f32.mrf.mxu1 }
 0x159   : > { %v552_v63 = vadd.f32 %v4431_v62, %v4423_v60 }
 0x15a   : > { %v4426_v0 = vpop.f32.mrf.mxu0  ;;  %v546_v1 = vpop.f32.mrf.mxu1 }
 0x15b   : > { %v566_v2 = vadd.f32 %v552_v63, %v4895_v17  ;;  %v547_v3 = vadd.f32 %v546_v1, %v449_v61 }
 0x15c   : > { %v459_v4 = vpop.f32.mrf.mxu0  ;;  %v4434_v6 = vpop.f32.mrf.mxu1 }
 0x15d   : > { %v570_v10 = vmax.f32 %v566_v2, 0.0  ;;  %v565_v8 = vadd.f32 %v547_v3, %v4884_v15  ;;  %v562_v11 = vadd.f32 %v4434_v6, %v4426_v0 }
 0x15e   : > { %v556_v12 = vpop.f32.mrf.mxu1  ;;  %v4439_v13 = vpop.f32.mrf.mxu0 }
 0x15f   : > { %v569_v14 = vmax.f32 %v565_v8, 0.0  ;;  %v557_v18 = vadd.f32 %v556_v12, %v459_v4  ;;  %v579_v19 = vmul.f32 %v5077_v9, %v570_v10  ;;  %v568_v23 = vadd.f32 %v562_v11, %v4900_v20 }
 0x160   : > { %v683_v21 = vpop.f32.mrf.mxu0  ;;  %v4447_v22 = vpop.f32.mrf.mxu1 }
 0x161   : > { %v567_v24 = vadd.f32 %v557_v18, %v4886_v16  ;;  %584 = vadd.xlane.f32.xlu0 %v579_v19  ;;  %v578_v25 = vmul.f32 %v5077_v9, %v569_v14  ;;  %v572_v32 = vmax.f32 %v568_v23, 0.0  ;;  %v774_v33 = vadd.f32 %v4447_v22, %v4439_v13 }
 0x162   : > { %v4442_v26 = vpop.f32.mrf.mxu0  ;;  %v768_v27 = vpop.f32.mrf.mxu1  ;;  %v595_v34 = vmul.f32 %v579_v19, %v570_v10  ;;  %v4777_v23 = vmov 9  }
 0x163   : > { %v571_v28 = vmax.f32 %v567_v24, 0.0  ;;  %582 = vadd.xlane.f32.xlu1 %v578_v25  ;;  %v594_v29 = vmul.f32 %v578_v25, %v569_v14  ;;  %v769_v38 = vadd.f32 %v768_v27, %v683_v21  ;;  %v788_v41 = vadd.f32 %v774_v33, %v4895_v17 }
 0x164   : > { %v693_v30 = vpop.f32.mrf.mxu0  ;;  %v4450_v31 = vpop.f32.mrf.mxu1  ;;  %v581_v42 = vmul.f32 %v5077_v9, %v572_v32  ;;  %4726 = vset.pattern.permute.xlu1 %v4777_v23 }
 0x165   : > { %598 = vadd.xlane.f32.xlu0 %v594_v29  ;;  %v580_v37 = vmul.f32 %v5077_v9, %v571_v28  ;;  %v787_v48 = vadd.f32 %v769_v38, %v4884_v15  ;;  %v792_v51 = vmax.f32 %v788_v41, 0.0  ;;  %v784_v60 = vadd.f32 %v4450_v31, %v4442_v26 }
 0x166   : > { %v778_v35 = vpop.f32.mrf.mxu1  ;;  %v5084_v36 = vpop.f32.mrf.mxu0  ;;  %v597_v54 = vmul.f32 %v581_v42, %v572_v32 }
 0x167   : > { %600 = vadd.xlane.f32.xlu1 %v595_v34  ;;  %v596_v46 = vmul.f32 %v580_v37, %v571_v28  ;;  %v791_v59 = vmax.f32 %v787_v48, 0.0  ;;  %v802_v1 = vmul.f32 %v5077_v9, %v792_v51  ;;  %v790_v6 = vadd.f32 %v784_v60, %v4900_v20 }
 0x168   : > { %v906_v39 = vpop.f32.mrf.mxu0  ;;  %v5087_v40 = vpop.f32.mrf.mxu1  ;;  %v779_v19 = vadd.f32 %v778_v35, %v693_v30 }
 0x169   : > { %586 = vadd.xlane.f32.xlu0 %v580_v37  ;;  %v801_v12 = vmul.f32 %v5077_v9, %v791_v59  ;;  %v794_v18 = vmax.f32 %v790_v6, 0.0  ;;  %v818_v27 = vmul.f32 %v802_v1, %v792_v51 }
 0x16a   : > { %v991_v43 = vpop.f32.mrf.mxu1  ;;  %v4458_v44 = vpop.f32.mrf.mxu0  ;;  %v789_v31 = vadd.f32 %v779_v19, %v4886_v16 }
 0x16b   : > { %v992_v45 = vadd.f32 %v991_v43, %v906_v39  ;;  %588 = vadd.xlane.f32.xlu1 %v581_v42  ;;  %v804_v34 = vmul.f32 %v5077_v9, %v794_v18  ;;  %v817_v39 = vmul.f32 %v801_v12, %v791_v59 }
 0x16c   : > { %v4466_v49 = vpop.f32.mrf.mxu1  ;;  %v916_v50 = vpop.f32.mrf.mxu0  ;;  %v793_v38 = vmax.f32 %v789_v31, 0.0 }
 0x16d   : > { %v1010_v52 = vadd.f32 %v992_v45, %v4884_v15  ;;  %v1007_v53 = vadd.f32 %v4466_v49, %v4458_v44  ;;  %602 = vadd.xlane.f32.xlu0 %v596_v46  ;;  %v997_v45 = vadd.f32 %v5087_v40, %v5084_v36 }
 0x16e   : > { %v1001_v55 = vpop.f32.mrf.mxu1  ;;  %v5093_v56 = vpop.f32.mrf.mxu0  ;;  %v803_v47 = vmul.f32 %v5077_v9, %v793_v38 }
 0x16f   : > { %v1014_v57 = vmax.f32 %v1010_v52, 0.0  ;;  %v5096_v58 = vadd.f32 %v1007_v53, %v4900_v20  ;;  %604 = vadd.xlane.f32.xlu1 %v597_v54  ;;  %v1002_v0 = vadd.f32 %v1001_v55, %v916_v50  ;;  %v1011_v52 = vadd.f32 %v997_v45, %v4895_v17 }
 0x170   : > { %v5098_v61 = vpop.f32.mrf.mxu1  ;;  %v5100_v62 = vpop.f32.mrf.mxu0  ;;  %v820_v55 = vmul.f32 %v804_v34, %v794_v18 }
 0x171   : > { %v1017_v63 = vmax.f32 %v5096_v58, 0.0  ;;  %v1024_v2 = vmul.f32 %v5077_v9, %v1014_v57  ;;  %v1012_v8 = vadd.f32 %v1002_v0, %v4886_v16  ;;  %v1015_v59 = vmax.f32 %v1011_v52, 0.0 }
 0x172   : > { %v5105_v3 = vpop.f32.mrf.mxu1  ;;  %v5107_v4 = vpop.f32.mrf.mxu0  ;;  %v819_v0 = vmul.f32 %v803_v47, %v793_v38 }
 0x173   : > { %807 = vadd.xlane.f32.xlu1 %v802_v1  ;;  %1028 = vadd.xlane.f32.xlu0 %v1024_v2  ;;  %v5118_v11 = vmul.f32 %v5077_v9, %v1017_v63  ;;  %v1016_v24 = vmax.f32 %v1012_v8, 0.0  ;;  %v1040_v26 = vmul.f32 %v1024_v2, %v1014_v57  ;;  %v1220_v8 = vadd.f32 %v5098_v61, %v5093_v56 }
 0x174   : > { %v5110_v7 = vpop.f32.mrf.mxu1  ;;  %v5112_v10 = vpop.f32.mrf.mxu0  ;;  %v1025_v18 = vmul.f32 %v5077_v9, %v1015_v59 }
 0x175   : > { %v1026_v30 = vmul.f32 %v5077_v9, %v1016_v24  ;;  %v1234_v23 = vadd.f32 %v1220_v8, %v4895_v17 }
 0x176   : > { %v5121_v13 = vpop.f32.mrf.mxu1  ;;  %v4487_v14 = vpop.f32.mrf.mxu0 }
 0x177   : > { %1034 = vadd.xlane.f32.xlu0 %v5118_v11  ;;  %805 = vadd.xlane.f32.xlu1 %v801_v12  ;;  %v1042_v44 = vmul.f32 %v1026_v30, %v1016_v24  ;;  %v1215_v24 = vadd.f32 %v5105_v3, %v5100_v62  ;;  %v1043_v3 = vmul.f32 %v5118_v11, %v1017_v63 }
 0x178   : > { %v4495_v21 = vpop.f32.mrf.mxu1  ;;  %v1352_v22 = vpop.f32.mrf.mxu0 }
 0x179   : > { %v1443_v25 = vadd.f32 %v4495_v21, %v4487_v14  ;;  %v1233_v31 = vadd.f32 %v1215_v24, %v4884_v15 }
 0x17a   : > { %v1437_v28 = vpop.f32.mrf.mxu1  ;;  %v4490_v35 = vpop.f32.mrf.mxu0 }
 0x17b   : > { %v1438_v29 = vadd.f32 %v1437_v28, %v1352_v22  ;;  %1044 = vadd.xlane.f32.xlu0 %v1040_v26  ;;  %823 = vadd.xlane.f32.xlu1 %v818_v27  ;;  %v1457_v32 = vadd.f32 %v1443_v25, %v4895_v17  ;;  %v1041_v27 = vmul.f32 %v1025_v18, %v1015_v59 }
 0x17c   : > { %v4498_v37 = vpop.f32.mrf.mxu1  ;;  %v1362_v50 = vpop.f32.mrf.mxu0 }
 0x17d   : > { %v1456_v33 = vadd.f32 %v1438_v29, %v4884_v15  ;;  %v1461_v41 = vmax.f32 %v1457_v32, 0.0  ;;  %v1453_v43 = vadd.f32 %v4498_v37, %v4490_v35  ;;  %v1238_v29 = vmax.f32 %v1234_v23, 0.0 }
 0x17e   : > { %v1447_v51 = vpop.f32.mrf.mxu1  ;;  %v4503_v40 = vpop.f32.mrf.mxu0  ;;  %v1237_v35 = vmax.f32 %v1233_v31, 0.0  ;;  %v1230_v37 = vadd.f32 %v5110_v7, %v5107_v4 }
 0x17f   : > { %1032 = vadd.xlane.f32.xlu0 %v1026_v30  ;;  %811 = vadd.xlane.f32.xlu1 %v804_v34  ;;  %v1460_v42 = vmax.f32 %v1456_v33, 0.0  ;;  %v1459_v46 = vadd.f32 %v1453_v43, %v4900_v20  ;;  %v5135_v49 = vmul.f32 %v5077_v9, %v1461_v41  ;;  %v1448_v54 = vadd.f32 %v1447_v51, %v1362_v50 }
 0x180   : > { %v4511_v57 = vpop.f32.mrf.mxu1  ;;  %v1575_v2 = vpop.f32.mrf.mxu0  ;;  %v1236_v11 = vadd.f32 %v1230_v37, %v4900_v20  ;;  %v1247_v7 = vmul.f32 %v5077_v9, %v1237_v35 }
 0x181   : > { %v1470_v48 = vmul.f32 %v5077_v9, %v1460_v42  ;;  %v1463_v53 = vmax.f32 %v1459_v46, 0.0  ;;  %v1487_v36 = vmul.f32 %v5135_v49, %v1461_v41  ;;  %v5140_v60 = vadd.f32 %v1448_v54, %v4886_v16 }
 0x182   : > { %v1660_v6 = vpop.f32.mrf.mxu1  ;;  %v1666_v14 = vadd.f32 %v4511_v57, %v4503_v40  ;;  %v4506_v21 = vpop.f32.mrf.mxu0  ;;  %v1248_v41 = vmul.f32 %v5077_v9, %v1238_v29 }
 0x183   : > { %1048 = vadd.xlane.f32.xlu0 %v1042_v44  ;;  %821 = vadd.xlane.f32.xlu1 %v817_v39  ;;  %v1473_v1 = vmul.f32 %v5077_v9, %v1463_v53  ;;  %v1462_v12 = vmax.f32 %v5140_v60, 0.0  ;;  %v1486_v19 = vmul.f32 %v1470_v48, %v1460_v42  ;;  %v1661_v26 = vadd.f32 %v1660_v6, %v1575_v2 }
 0x184   : > { %v4514_v22 = vpop.f32.mrf.mxu1  ;;  %v1680_v25 = vadd.f32 %v1666_v14, %v4895_v17  ;;  %v1585_v61 = vpop.f32.mrf.mxu0  ;;  %v1263_v2 = vmul.f32 %v1247_v7, %v1237_v35 }
 0x185   : > { %v5154_v56 = vmul.f32 %v5077_v9, %v1462_v12  ;;  %v5159_v62 = vadd.f32 %v1661_v26, %v4884_v15  ;;  %v1489_v33 = vmul.f32 %v1473_v1, %v1463_v53  ;;  %v1676_v39 = vadd.f32 %v4514_v22, %v4506_v21 }
 0x186   : > { %v1670_v28 = vpop.f32.mrf.mxu1  ;;  %v1684_v32 = vmax.f32 %v1680_v25, 0.0  ;;  %v5164_v30 = vpop.f32.mrf.mxu0  ;;  %v1264_v53 = vmul.f32 %v1248_v41, %v1238_v29 }
 0x187   : > { %809 = vadd.xlane.f32.xlu1 %v803_v47  ;;  %1474 = vadd.xlane.f32.xlu0 %v1470_v48  ;;  %v1683_v38 = vmax.f32 %v5159_v62, 0.0  ;;  %v1682_v43 = vadd.f32 %v1676_v39, %v4900_v20  ;;  %v1671_v44 = vadd.f32 %v1670_v28, %v1585_v61  ;;  %v1240_v47 = vmax.f32 %v1236_v11, 0.0 }
 0x188   : > { %v5166_v34 = vpop.f32.mrf.mxu1  ;;  %v1694_v58 = vmul.f32 %v5077_v9, %v1684_v32  ;;  %v5173_v42 = vpop.f32.mrf.mxu0  ;;  %v1225_v48 = vadd.f32 %v5121_v13, %v5112_v10 }
 0x189   : > { %v5182_v4 = vmul.f32 %v5077_v9, %v1683_v38  ;;  %v1686_v50 = vmax.f32 %v1682_v43, 0.0  ;;  %v1681_v51 = vadd.f32 %v1671_v44, %v4886_v16  ;;  %v1889_v35 = vadd.f32 %v5166_v34, %v5164_v30 }
 0x18a   : > { %v5175_v63 = vpop.f32.mrf.mxu1  ;;  %v5185_v45 = vpop.f32.mrf.mxu0  ;;  %v1710_v52 = vmul.f32 %v1694_v58, %v1684_v32  ;;  %v1488_v30 = vmul.f32 %v5154_v56, %v1462_v12 }
 0x18b   : > { %827 = vadd.xlane.f32.xlu1 %v820_v55  ;;  %1492 = vadd.xlane.f32.xlu0 %v1487_v36  ;;  %v1235_v36 = vadd.f32 %v1225_v48, %v4886_v16  ;;  %v1685_v40 = vmax.f32 %v1681_v51, 0.0  ;;  %v1696_v59 = vmul.f32 %v5077_v9, %v1686_v50  ;;  %v1903_v43 = vadd.f32 %v1889_v35, %v4895_v17 }
 0x18c   : > { %v5187_v46 = vpop.f32.mrf.mxu1  ;;  %v1808_v54 = vpop.f32.mrf.mxu0  ;;  %v1884_v44 = vadd.f32 %v5175_v63, %v5173_v42 }
 0x18d   : > { %v1239_v10 = vmax.f32 %v1235_v36, 0.0  ;;  %v1899_v12 = vadd.f32 %v5187_v46, %v5185_v45 }
 0x18e   : > { %v1893_v55 = vpop.f32.mrf.mxu1  ;;  %v4535_v6 = vpop.f32.mrf.mxu0  ;;  %v1902_v51 = vadd.f32 %v1884_v44, %v4884_v15 }
 0x18f   : > { %825 = vadd.xlane.f32.xlu1 %v819_v0  ;;  %1480 = vadd.xlane.f32.xlu0 %v1473_v1  ;;  %v1894_v57 = vadd.f32 %v1893_v55, %v1808_v54  ;;  %v1250_v0 = vmul.f32 %v5077_v9, %v1240_v47  ;;  %v1695_v1 = vmul.f32 %v5077_v9, %v1685_v40 }
 0x190   : > { %v4543_v8 = vpop.f32.mrf.mxu1  ;;  %v1249_v21 = vmul.f32 %v5077_v9, %v1239_v10  ;;  %v2021_v22 = vpop.f32.mrf.mxu0 }
 0x191   : > { %v1904_v13 = vadd.f32 %v1894_v57, %v4886_v16  ;;  %v1711_v25 = vmul.f32 %v1695_v1, %v1685_v40  ;;  %v1266_v26 = vmul.f32 %v1250_v0, %v1240_v47 }
 0x192   : > { %v2106_v23 = vpop.f32.mrf.mxu1  ;;  %v4538_v61 = vpop.f32.mrf.mxu0  ;;  %v1265_v29 = vmul.f32 %v1249_v21, %v1239_v10 }
 0x193   : > { %1030 = vadd.xlane.f32.xlu1 %v1025_v18  ;;  %1490 = vadd.xlane.f32.xlu0 %v1486_v19  ;;  %v1908_v14 = vmax.f32 %v1904_v13, 0.0  ;;  %v2112_v18 = vadd.f32 %v4543_v8, %v4535_v6  ;;  %v1712_v19 = vmul.f32 %v1696_v59, %v1686_v50  ;;  %v2107_v32 = vadd.f32 %v2106_v23, %v2021_v22 }
 0x194   : > { %v4546_v28 = vpop.f32.mrf.mxu1  ;;  %v1907_v50 = vmax.f32 %v1903_v43, 0.0  ;;  %v4780_v23 = vmov 10   ;;  %v4782_v43 = vmov 15  }
 0x195   : > { %v2126_v24 = vadd.f32 %v2112_v18, %v4895_v17  ;;  %v2125_v37 = vadd.f32 %v2107_v32, %v4884_v15 }
 0x196   : > { %v2116_v11 = vpop.f32.mrf.mxu1 }
 0x197   : > { %1046 = vadd.xlane.f32.xlu1 %v1041_v27  ;;  %1478 = vadd.xlane.f32.xlu0 %v5154_v56  ;;  %v1918_v27 = vmul.f32 %v5077_v9, %v1908_v14  ;;  %v2130_v31 = vmax.f32 %v2126_v24, 0.0  ;;  %v2129_v34 = vmax.f32 %v2125_v37, 0.0  ;;  %v1906_v56 = vmax.f32 %v1902_v51, 0.0 }
 0x199   : > { %v2139_v60 = vmul.f32 %v5077_v9, %v2129_v34  ;;  %v1916_v54 = vmul.f32 %v5077_v9, %v1906_v56 }
 0x19b   : > { %1050 = vadd.xlane.f32.xlu1 %v1043_v3  ;;  %1496 = vadd.xlane.f32.xlu0 %v1489_v33  ;;  %v2122_v3 = vadd.f32 %v4546_v28, %v4538_v61  ;;  %v1934_v33 = vmul.f32 %v1918_v27, %v1908_v14  ;;  %v2155_v62 = vmul.f32 %v2139_v60, %v2129_v34  ;;  %v4779_v14 = vmov 12  }
 0x19c   : > { %v1932_v57 = vmul.f32 %v1916_v54, %v1906_v56 }
 0x19d   : > { %v2128_v39 = vadd.f32 %v2122_v3, %v4900_v20 }
 0x19f   : > { %1253 = vadd.xlane.f32.xlu1 %v1248_v41  ;;  %1699 = vadd.xlane.f32.xlu0 %v1694_v58  ;;  %v2140_v41 = vmul.f32 %v5077_v9, %v2130_v31  ;;  %v2031_v58 = vpop.f32.mrf.mxu0 }
 0x1a0   : > { %v2117_v47 = vadd.f32 %v2116_v11, %v2031_v58 }
 0x1a1   : > { %v2156_v48 = vmul.f32 %v2140_v41, %v2130_v31 }
 0x1a3   : > { %1697 = vadd.xlane.f32.xlu0 %v5182_v4  ;;  %1251 = vadd.xlane.f32.xlu1 %v1247_v7  ;;  %v2132_v7 = vmax.f32 %v2128_v39, 0.0 }
 0x1a5   : > { %v2142_v42 = vmul.f32 %v5077_v9, %v2132_v7 }
 0x1a7   : > { %1715 = vadd.xlane.f32.xlu0 %v1710_v52  ;;  %1269 = vadd.xlane.f32.xlu1 %v1264_v53  ;;  %v2127_v52 = vadd.f32 %v2117_v47, %v4886_v16  ;;  %v1917_v53 = vmul.f32 %v5077_v9, %v1907_v50  ;;  %v2158_v36 = vmul.f32 %v2142_v42, %v2132_v7 }
 0x1a9   : > { %v2131_v63 = vmax.f32 %v2127_v52, 0.0  ;;  %v1933_v40 = vmul.f32 %v1917_v53, %v1907_v50 }
 0x1ab   : > { %1703 = vadd.xlane.f32.xlu0 %v1696_v59  ;;  %1257 = vadd.xlane.f32.xlu1 %v1250_v0 }
 0x1af   : > { %1701 = vadd.xlane.f32.xlu0 %v1695_v1  ;;  %1267 = vadd.xlane.f32.xlu1 %v1263_v2  ;;  %v4778_v2 = vmov 11  }
 0x1b3   : > { %1719 = vadd.xlane.f32.xlu0 %v1712_v19  ;;  %1255 = vadd.xlane.f32.xlu1 %v1249_v21 }
 0x1b7   : > { %1717 = vadd.xlane.f32.xlu0 %v1711_v25  ;;  %1273 = vadd.xlane.f32.xlu1 %v1266_v26 }
 0x1bb   : > { %1271 = vadd.xlane.f32.xlu1 %v1265_v29  ;;  %1940 = vadd.xlane.f32.xlu0 %v1934_v33 }
 0x1bf   : > { %1476 = vadd.xlane.f32.xlu1 %v5135_v49  ;;  %2145 = vadd.xlane.f32.xlu0 %v2140_v41  ;;  %v1709_v49 = vmul.f32 %v5182_v4, %v1683_v38  ;;  %v1905_v38 = vadd.f32 %v1899_v12, %v4900_v20  ;;  %v2141_v4 = vmul.f32 %v5077_v9, %v2131_v63  ;;  %v4781_v41 = vmov 14  }
 0x1c1   : > { %v1909_v55 = vmax.f32 %v1905_v38, 0.0  ;;  %v2157_v45 = vmul.f32 %v2141_v4, %v2131_v63 }
 0x1c3   : > { %1494 = vadd.xlane.f32.xlu1 %v1488_v30  ;;  %2161 = vadd.xlane.f32.xlu0 %v2156_v48  ;;  %v1919_v46 = vmul.f32 %v5077_v9, %v1909_v55 }
 0x1c5   : > { %v1935_v59 = vmul.f32 %v1919_v46, %v1909_v55 }
 0x1c7   : > { %1713 = vadd.xlane.f32.xlu1 %v1709_v49  ;;  %2149 = vadd.xlane.f32.xlu0 %v2142_v42 }
 0x1cb   : > { %1922 = vadd.xlane.f32.xlu1 %v1917_v53  ;;  %2159 = vadd.xlane.f32.xlu0 %v2155_v62 }
 0x1cf   : > { %2147 = vadd.xlane.f32.xlu0 %v2141_v4  ;;  %1920 = vadd.xlane.f32.xlu1 %v1916_v54 }
 0x1d3   : > { %2165 = vadd.xlane.f32.xlu0 %v2158_v36  ;;  %1938 = vadd.xlane.f32.xlu1 %v1933_v40 }
 0x1d7   : > { %2163 = vadd.xlane.f32.xlu0 %v2157_v45  ;;  %1926 = vadd.xlane.f32.xlu1 %v1919_v46 }
 0x1db   : > { %1936 = vadd.xlane.f32.xlu1 %v1932_v57 }
 0x1df   : > { %1924 = vadd.xlane.f32.xlu1 %v1918_v27 }
 0x1e3   : > { %1942 = vadd.xlane.f32.xlu1 %v1935_v59 }
 0x1e7   : > { %2143 = vadd.xlane.f32.xlu1 %v2139_v60 }
 0x1ea   : > { %v5227_v0 = vpop.xlane.xlu0 %584 }
 0x1ec   : > { %v5229_v10 = vpop.xlane.xlu1 %582 }
 0x1ed   : > { %2172 = vperm.xlu0 %4725, %v4860_v5  }
 0x1ee   : > { %v5232_v13 = vpop.xlane.xlu0 %598 }
 0x1f0   : > { %v5234_v1 = vpop.xlane.xlu1 %600 }
 0x1f1   : > { %4728 = vset.pattern.permute.xlu0 %v4778_v2 }
 0x1f2   : > { %v587_v6 = vpop.xlane.xlu0 %586  ;;  %2841 = vperm.xlu0 %4728, %v4860_v5  }
 0x1f4   : > { %v5237_v8 = vpop.xlane.xlu1 %588 }
 0x1f6   : > { %4729 = vset.pattern.permute.xlu0 %v4779_v14  ;;  %v603_v18 = vpop.xlane.xlu0 %602 }
 0x1f7   : > { %3064 = vperm.xlu0 %4729, %v4860_v5  }
 0x1f8   : > { %v605_v19 = vpop.xlane.xlu1 %604  ;;  %2395 = vperm.xlu1 %4726, %v4860_v5  }
 0x1fb   : > { %4731 = vset.pattern.permute.xlu0 %v4781_v41 }
 0x1fc   : > { %v808_v21 = vpop.xlane.xlu1 %807  ;;  %v5241_v22 = vpop.xlane.xlu0 %1028  ;;  %4727 = vset.pattern.permute.xlu1 %v4780_v23  ;;  %3510 = vperm.xlu0 %4731, %v4860_v5  }
 0x1fd   : > { %2618 = vperm.xlu1 %4727, %v4860_v5  }
 0x200   : > { %v5244_v24 = vpop.xlane.xlu1 %805  ;;  %v5246_v25 = vpop.xlane.xlu0 %1034  ;;  %4732 = vset.pattern.permute.xlu0 %v4782_v43 }
 0x201   : > { %3733 = vperm.xlu0 %4732, %v4860_v5  }
 0x204   : > { %v824_v26 = vpop.xlane.xlu1 %823  ;;  %v5248_v27 = vpop.xlane.xlu0 %1044 }
 0x208   : > { %v5250_v61 = vpop.xlane.xlu1 %811  ;;  %v1033_v28 = vpop.xlane.xlu0 %1032 }
 0x20c   : > { %v5252_v29 = vpop.xlane.xlu1 %821  ;;  %v1049_v31 = vpop.xlane.xlu0 %1048 }
 0x210   : > { %v810_v32 = vpop.xlane.xlu1 %809  ;;  %v5254_v3 = vpop.xlane.xlu0 %1474 }
 0x211   : > { %v815_v12 = vadd.f32 %v810_v32, %v587_v6 }
 0x213   : > { %v1038_v53 = vadd.f32 %v1033_v28, %v815_v12  ;;  %v814_v28 = vadd.f32 %v808_v21, %v5227_v0 }
 0x214   : > { %v828_v33 = vpop.xlane.xlu1 %827  ;;  %v5256_v35 = vpop.xlane.xlu0 %1492 }
 0x215   : > { %v832_v38 = vadd.f32 %v828_v33, %v605_v19 }
 0x218   : > { %v826_v37 = vpop.xlane.xlu1 %825  ;;  %v5258_v39 = vpop.xlane.xlu0 %1480 }
 0x219   : > { %v831_v14 = vadd.f32 %v826_v37, %v603_v18  ;;  %v816_v18 = vadd.f32 %v5250_v61, %v5237_v8 }
 0x21b   : > { %v1054_v41 = vadd.f32 %v1049_v31, %v831_v14 }
 0x21c   : > { %v1031_v58 = vpop.xlane.xlu1 %1030  ;;  %v5261_v11 = vpop.xlane.xlu0 %1490 }
 0x21d   : > { %v1037_v43 = vadd.f32 %v1031_v58, %v814_v28  ;;  %v1039_v58 = vadd.f32 %v5246_v25, %v816_v18  ;;  %v5354_v18 = vld [vmem:[%s5694_s2 + $0x18] sm:$0xff] }
 0x220   : > { %v1047_v44 = vpop.xlane.xlu1 %1046  ;;  %v1479_v30 = vpop.xlane.xlu0 %1478 }
 0x224   : > { %v1051_v34 = vpop.xlane.xlu1 %1050  ;;  %v1497_v7 = vpop.xlane.xlu0 %1496 }
 0x225   : > { %v1055_v54 = vadd.f32 %v1051_v34, %v832_v38 }
 0x228   : > { %v1254_v47 = vpop.xlane.xlu1 %1253  ;;  %v1700_v48 = vpop.xlane.xlu0 %1699 }
 0x22c   : > { %v5264_v50 = vpop.xlane.xlu1 %1251  ;;  %v5266_v49 = vpop.xlane.xlu0 %1697 }
 0x230   : > { %v1270_v51 = vpop.xlane.xlu1 %1269  ;;  %v1716_v52 = vpop.xlane.xlu0 %1715 }
 0x234   : > { %v1258_v42 = vpop.xlane.xlu1 %1257  ;;  %v1704_v60 = vpop.xlane.xlu0 %1703 }
 0x238   : > { %v1268_v56 = vpop.xlane.xlu1 %1267  ;;  %v1702_v63 = vpop.xlane.xlu0 %1701 }
 0x23c   : > { %v1256_v62 = vpop.xlane.xlu1 %1255  ;;  %v1720_v5 = vpop.xlane.xlu0 %1719 }
 0x23d   : > { %v1261_v4 = vadd.f32 %v1256_v62, %v1038_v53  ;;  %v830_v53 = vadd.f32 %v824_v26, %v5234_v1  ;;  %v1262_v26 = vadd.f32 %v1258_v42, %v1039_v58 }
 0x23f   : > { %v1484_v55 = vadd.f32 %v1479_v30, %v1261_v4  ;;  %v1260_v30 = vadd.f32 %v1254_v47, %v1037_v43  ;;  %v1053_v37 = vadd.f32 %v1047_v44, %v830_v53  ;;  %v829_v47 = vadd.f32 %v5252_v29, %v5232_v13 }
 0x240   : > { %v1274_v36 = vpop.xlane.xlu1 %1273  ;;  %v1718_v40 = vpop.xlane.xlu0 %1717  ;;  %v1485_v61 = vadd.f32 %v5258_v39, %v1262_v26 }
 0x241   : > { %v1278_v45 = vadd.f32 %v1274_v36, %v1055_v54  ;;  %v1707_v46 = vadd.f32 %v1702_v63, %v1484_v55  ;;  %v1276_v4 = vadd.f32 %v1270_v51, %v1053_v37  ;;  %v1052_v44 = vadd.f32 %v5248_v27, %v829_v47 }
 0x242   : > { %v1708_v13 = vadd.f32 %v1704_v60, %v1485_v61 }
 0x243   : > { %v1501_v57 = vadd.f32 %v1497_v7, %v1278_v45  ;;  %v1499_v1 = vadd.f32 %v5256_v35, %v1276_v4  ;;  %v1275_v45 = vadd.f32 %v1268_v56, %v1052_v44 }
 0x244   : > { %v1272_v59 = vpop.xlane.xlu1 %1271  ;;  %v1941_v2 = vpop.xlane.xlu0 %1940 }
 0x245   : > { %v5268_v23 = vadd.f32 %v1720_v5, %v1501_v57  ;;  %v1277_v19 = vadd.f32 %v1272_v59, %v1054_v41  ;;  %v1722_v8 = vadd.f32 %v1716_v52, %v1499_v1  ;;  %v813_v57 = vadd.f32 %v5244_v24, %v5229_v10 }
 0x246   : > { %v1498_v59 = vadd.f32 %v5261_v11, %v1275_v45  ;;  %v5297_v11 = vld [vmem:[%s4893_s19] sm:$0xff] }
 0x247   : > { %v1036_v27 = vadd.f32 %v5241_v22, %v813_v57 }
 0x248   : > { %v1477_v6 = vpop.xlane.xlu1 %1476  ;;  %v2146_v32 = vpop.xlane.xlu0 %2145 }
 0x249   : > { %v1483_v63 = vadd.f32 %v1477_v6, %v1260_v30  ;;  %v1259_v6 = vadd.f32 %v5264_v50, %v1036_v27 }
 0x24b   : > { %v1706_v0 = vadd.f32 %v1700_v48, %v1483_v63  ;;  %v1482_v28 = vadd.f32 %v5254_v3, %v1259_v6  ;;  %v5308_v3 = vld [vmem:[%s5695_s3 + $0x8] sm:$0xff]  ;;  %v5331_v63 = vld [vmem:[%s5694_s2 + $0x10] sm:$0xff] }
 0x24c   : > { %v1495_v33 = vpop.xlane.xlu1 %1494  ;;  %v2162_v34 = vpop.xlane.xlu0 %2161 }
 0x24d   : > { %v1500_v12 = vadd.f32 %v1495_v33, %v1277_v19  ;;  %v1705_v50 = vadd.f32 %v5266_v49, %v1482_v28 }
 0x24f   : > { %v1723_v7 = vadd.f32 %v1718_v40, %v1500_v12 }
 0x250   : > { %v1714_v62 = vpop.xlane.xlu1 %1713  ;;  %v2150_v38 = vpop.xlane.xlu0 %2149 }
 0x251   : > { %v1946_v5 = vadd.f32 %v1941_v2, %v1723_v7  ;;  %v1721_v39 = vadd.f32 %v1714_v62, %v1498_v59  ;;  %v5340_v62 = vld [vmem:[%s5695_s3 + $0x18] sm:$0xff] }
 0x254   : > { %v1923_v21 = vpop.xlane.xlu1 %1922  ;;  %v2160_v31 = vpop.xlane.xlu0 %2159 }
 0x255   : > { %v1929_v54 = vadd.f32 %v1923_v21, %v1706_v0 }
 0x257   : > { %v5278_v55 = vadd.f32 %v2146_v32, %v1929_v54 }
 0x258   : > { %v1921_v36 = vpop.xlane.xlu1 %1920  ;;  %v2148_v40 = vpop.xlane.xlu0 %2147 }
 0x259   : > { %v1928_v49 = vadd.f32 %v1921_v36, %v1705_v50 }
 0x25c   : > { %v1939_v48 = vpop.xlane.xlu1 %1938  ;;  %v2166_v51 = vpop.xlane.xlu0 %2165 }
 0x25d   : > { %v1945_v25 = vadd.f32 %v1939_v48, %v1722_v8 }
 0x25f   : > { %v5284_v29 = vadd.f32 %v2162_v34, %v1945_v25 }
 0x260   : > { %v1927_v35 = vpop.xlane.xlu1 %1926  ;;  %v2164_v42 = vpop.xlane.xlu0 %2163 }
 0x261   : > { %v1931_v52 = vadd.f32 %v1927_v35, %v1708_v13  ;;  %v5287_v2 = vadd.f32 %v2164_v42, %v1946_v5  ;;  %v5361_v5 = vld [vmem:[%s5694_s2] sm:$0xff] }
 0x263   : > { %v5290_v14 = vadd.f32 %v2150_v38, %v1931_v52  ;;  %v5347_v38 = vld [vmem:[%s5695_s3] sm:$0xff] }
 0x264   : > { %v1937_v56 = vpop.xlane.xlu1 %1936 }
 0x265   : > { %v1944_v10 = vadd.f32 %v1937_v56, %v1721_v39 }
 0x267   : > { %v5293_v24 = vadd.f32 %v2160_v31, %v1944_v10 }
 0x268   : > { %v1925_v60 = vpop.xlane.xlu1 %1924  ;;  %v2173_v32 = vpop.permute.xlu0 %2172 }
 0x269   : > { %v1930_v41 = vadd.f32 %v1925_v60, %v1707_v46  ;;  %v2175_v43 = vsub.f32 %v2173_v32, %v5297_v11  ;;  %v2177_v22 = vmul.f32 %v5297_v11, %v2173_v32  ;;  %v5315_v46 = vld [vmem:[%s5695_s3 + $0x10] sm:$0xff] }
 0x26b   : > { %v2176_v19 = vand.u32 2147483647, %v2175_v43  ;;  %4547 = vmatprep.subr.mxu0 %v2177_v22  ;;  %v5301_v33 = vadd.f32 %v2148_v40, %v1930_v41 }
 0x26c   : > { %v1943_v34 = vpop.xlane.xlu1 %1942  ;;  %4548 = vmatpush3.msra.mxu0 %v2177_v22 }
 0x26d   : > { %v1947_v30 = vadd.f32 %v1943_v34, %v5268_v23  ;;  %4550 = vmatmul.mubr.msk.f32.vlgmr.msra.gmra.mxu0 %vm370_vm0, %v5308_v3  ;;  %4555 = vmatprep.subr.mxu1 %v2176_v19  ;;  %v5322_v23 = vld [vmem:[%s5694_s2 + $0x8] sm:$0xff]  ;;  %v2842_v21 = vpop.permute.xlu0 %2841 }
 0x26e   : > { %4556 = vmatpush3.msra.mxu1 %v2176_v19  ;;  %4552 = vmatprep.mubr.msk.f32.mxu0 %vm370_vm0, %v5315_v46  ;;  %v2844_v54 = vsub.f32 %v2842_v21, %v5297_v11  ;;  %v2846_v40 = vmul.f32 %v5297_v11, %v2842_v21 }
 0x26f   : > { %4558 = vmatmul.mubr.msk.f32.vlgmr.msra.gmra.mxu1 %vm370_vm0, %v5322_v23  ;;  %v5326_v12 = vadd.f32 %v2166_v51, %v1947_v30  ;;  %v4783_v51 = vmov 13  }
 0x270   : > { %v2144_v53 = vpop.xlane.xlu1 %2143  ;;  %4560 = vmatprep.mubr.msk.f32.mxu1 %vm370_vm0, %v5331_v63  ;;  %v2845_v8 = vand.u32 2147483647, %v2844_v54  ;;  %4730 = vset.pattern.permute.xlu1 %v4783_v51  ;;  %v4742_v51 = vld [vmem:[%s4857_s12] sm:$0xff]  ;;  %s4257_s12 = sshll.u32 %s5704_s21, 5 }
 0x271   : > { %v5335_v7 = vadd.f32 %v2144_v53, %v1928_v49  ;;  %4553 = vmatmul.mubr.msk.f32.gmra.mxu0 %vm370_vm0, %v5340_v62  ;;  %s5661_s11 = scalar_lea.vmem %s5697_s5, %s4257_s12  ;;  %s321_s15 = scalar_lea.vmem %s5698_s6, %s4257_s12 }
 0x272   : > { %4565 = vmatprep.mubr.msk.f32.mxu0 %vm370_vm0, %v5347_v38  ;;  %v3065_v26 = vpop.permute.xlu0 %3064 }
 0x273   : > { %4561 = vmatmul.mubr.msk.f32.gmra.mxu1 %vm370_vm0, %v5354_v18  ;;  %v3067_v61 = vsub.f32 %v3065_v26, %v5297_v11  ;;  %v3069_v44 = vmul.f32 %v5297_v11, %v3065_v26 }
 0x274   : > { %v2396_v37 = vpop.permute.xlu1 %2395  ;;  %4573 = vmatprep.mubr.msk.f32.mxu1 %vm370_vm0, %v5361_v5 }
 0x275   : > { %v2398_v4 = vsub.f32 %v2396_v37, %v5297_v11  ;;  %v2400_v0 = vmul.f32 %v5297_v11, %v2396_v37  ;;  %v3068_v48 = vand.u32 2147483647, %v3067_v61 }
 0x277   : > { %v2399_v31 = vand.u32 2147483647, %v2398_v4  ;;  %4563 = vmatprep.subr.mxu0 %v2400_v0 }
 0x278   : > { %4564 = vmatpush3.msra.mxu0 %v2400_v0  ;;  %v2619_v58 = vpop.permute.xlu1 %2618 }
 0x279   : > { %4571 = vmatprep.subr.mxu1 %v2399_v31  ;;  %4566 = vmatmul.mubr.msk.f32.vlgmr.msra.gmra.mxu0 %vm370_vm0, %v5308_v3  ;;  %v2621_v47 = vsub.f32 %v2619_v58, %v5297_v11  ;;  %v2623_v1 = vmul.f32 %v5297_v11, %v2619_v58 }
 0x27a   : > { %4572 = vmatpush3.msra.mxu1 %v2399_v31  ;;  %4568 = vmatprep.mubr.msk.f32.mxu0 %vm370_vm0, %v5315_v46 }
 0x27b   : > { %4574 = vmatmul.mubr.msk.f32.vlgmr.msra.gmra.mxu1 %vm370_vm0, %v5322_v23  ;;  %v2622_v36 = vand.u32 2147483647, %v2621_v47  ;;  %4579 = vmatprep.subr.mxu0 %v2623_v1 }
 0x27c   : > { %4576 = vmatprep.mubr.msk.f32.mxu1 %vm370_vm0, %v5331_v63  ;;  %4580 = vmatpush3.msra.mxu0 %v2623_v1 }
 0x27d   : > { %4569 = vmatmul.mubr.msk.f32.gmra.mxu0 %vm370_vm0, %v5340_v62  ;;  %4587 = vmatprep.subr.mxu1 %v2622_v36 }
 0x27e   : > { %4581 = vmatprep.mubr.msk.f32.mxu0 %vm370_vm0, %v5347_v38  ;;  %4588 = vmatpush3.msra.mxu1 %v2622_v36 }
 0x27f   : > { %4577 = vmatmul.mubr.msk.f32.gmra.mxu1 %vm370_vm0, %v5354_v18  ;;  %4595 = vmatprep.subr.mxu0 %v2846_v40 }
 0x280   : > { %4589 = vmatprep.mubr.msk.f32.mxu1 %vm370_vm0, %v5361_v5  ;;  %4603 = vmatprep.subr.mxu1 %v2845_v8 }
 0x281   : > { %4582 = vmatmul.mubr.msk.f32.vlgmr.msra.gmra.mxu0 %vm370_vm0, %v5308_v3 }
 0x282   : > { %4584 = vmatprep.mubr.msk.f32.mxu0 %vm370_vm0, %v5315_v46  ;;  %4596 = vmatpush3.msra.mxu0 %v2846_v40 }
 0x283   : > { %4590 = vmatmul.mubr.msk.f32.vlgmr.msra.gmra.mxu1 %vm370_vm0, %v5322_v23  ;;  %4611 = vmatprep.subr.mxu0 %v3069_v44 }
 0x284   : > { %4592 = vmatprep.mubr.msk.f32.mxu1 %vm370_vm0, %v5331_v63  ;;  %4604 = vmatpush3.msra.mxu1 %v2845_v8 }
 0x285   : > { %4585 = vmatmul.mubr.msk.f32.gmra.mxu0 %vm370_vm0, %v5340_v62  ;;  %4619 = vmatprep.subr.mxu1 %v3068_v48 }
 0x286   : > { %4597 = vmatprep.mubr.msk.f32.mxu0 %vm370_vm0, %v5347_v38 }
 0x287   : > { %4593 = vmatmul.mubr.msk.f32.gmra.mxu1 %vm370_vm0, %v5354_v18 }
 0x288   : > { %4605 = vmatprep.mubr.msk.f32.mxu1 %vm370_vm0, %v5361_v5 }
 0x289   : > { %4598 = vmatmul.mubr.msk.f32.vlgmr.msra.gmra.mxu0 %vm370_vm0, %v5308_v3 }
 0x28a   : > { %4600 = vmatprep.mubr.msk.f32.mxu0 %vm370_vm0, %v5315_v46  ;;  %4612 = vmatpush3.msra.mxu0 %v3069_v44 }
 0x28b   : > { %4606 = vmatmul.mubr.msk.f32.vlgmr.msra.gmra.mxu1 %vm370_vm0, %v5322_v23 }
 0x28c   : > { %4608 = vmatprep.mubr.msk.f32.mxu1 %vm370_vm0, %v5331_v63  ;;  %4620 = vmatpush3.msra.mxu1 %v3068_v48 }
 0x28d   : > { %4601 = vmatmul.mubr.msk.f32.gmra.mxu0 %vm370_vm0, %v5340_v62 }
 0x28e   : > { %4613 = vmatprep.mubr.msk.f32.mxu0 %vm370_vm0, %v5347_v38 }
 0x28f   : > { %4609 = vmatmul.mubr.msk.f32.gmra.mxu1 %vm370_vm0, %v5354_v18 }
 0x290   : > { %4621 = vmatprep.mubr.msk.f32.mxu1 %vm370_vm0, %v5361_v5 }
 0x291   : > { %4614 = vmatmul.mubr.msk.f32.vlgmr.msra.gmra.mxu0 %vm370_vm0, %v5308_v3 }
 0x292   : > { %4616 = vmatprep.mubr.msk.f32.mxu0 %vm370_vm0, %v5315_v46 }
 0x293   : > { %4622 = vmatmul.mubr.msk.f32.vlgmr.msra.gmra.mxu1 %vm370_vm0, %v5322_v23 }
 0x294   : > { %4624 = vmatprep.mubr.msk.f32.mxu1 %vm370_vm0, %v5331_v63 }
 0x295   : > { %4617 = vmatmul.mubr.msk.f32.gmra.mxu0 %vm370_vm0, %v5340_v62 }
 0x296   : > { %4629 = vmatprep.mubr.msk.f32.mxu0 %vm370_vm0, %v5347_v38 }
 0x297   : > { %4625 = vmatmul.mubr.msk.f32.gmra.mxu1 %vm370_vm0, %v5354_v18 }
 0x298   : > { %4637 = vmatprep.mubr.msk.f32.mxu1 %vm370_vm0, %v5361_v5 }
 0x32d   : > { %v4551_v45 = vpop.f32.mrf.mxu0 }
 0x32f   : > { %v2244_v25 = vpop.f32.mrf.mxu0  ;;  %v4559_v57 = vpop.f32.mrf.mxu1 }
 0x330   : > { %v2335_v27 = vadd.f32 %v4559_v57, %v4551_v45 }
 0x331   : > { %v2329_v13 = vpop.f32.mrf.mxu1  ;;  %v4554_v35 = vpop.f32.mrf.mxu0 }
 0x332   : > { %v2330_v42 = vadd.f32 %v2329_v13, %v2244_v25  ;;  %v2349_v32 = vadd.f32 %v2335_v27, %v4895_v17 }
 0x333   : > { %v4562_v59 = vpop.f32.mrf.mxu1  ;;  %v2254_v52 = vpop.f32.mrf.mxu0 }
 0x334   : > { %v5438_v39 = vadd.f32 %v2330_v42, %v4884_v15  ;;  %v2345_v56 = vadd.f32 %v4562_v59, %v4554_v35  ;;  %v2353_v50 = vmax.f32 %v2349_v32, 0.0 }
 0x335   : > { %v2339_v6 = vpop.f32.mrf.mxu1 }
 0x336   : > { %v2352_v10 = vmax.f32 %v5438_v39, 0.0  ;;  %v2340_v60 = vadd.f32 %v2339_v6, %v2254_v52  ;;  %v2351_v28 = vadd.f32 %v2345_v56, %v4900_v20  ;;  %v5465_v21 = vmul.f32 %v5077_v9, %v2353_v50 }
 0x338   : > { %v5444_v41 = vadd.f32 %v2340_v60, %v4886_v16  ;;  %v5449_v43 = vmul.f32 %v5077_v9, %v2352_v10  ;;  %v2355_v30 = vmax.f32 %v2351_v28, 0.0  ;;  %v2379_v1 = vmul.f32 %v5465_v21, %v2353_v50 }
 0x339   : > { %v4567_v22 = vpop.f32.mrf.mxu0 }
 0x33a   : > { %v2354_v19 = vmax.f32 %v5444_v41, 0.0  ;;  %2366 = vadd.xlane.f32.xlu1 %v5449_v43  ;;  %v2365_v0 = vmul.f32 %v5077_v9, %v2355_v30 }
 0x33b   : > { %v4575_v34 = vpop.f32.mrf.mxu1  ;;  %v5458_v53 = vpop.f32.mrf.mxu0 }
 0x33c   : > { %v5456_v49 = vmul.f32 %v5077_v9, %v2354_v19  ;;  %v2558_v4 = vadd.f32 %v4575_v34, %v4567_v22  ;;  %v2381_v61 = vmul.f32 %v2365_v0, %v2355_v30 }
 0x33d   : > { %v5460_v37 = vpop.f32.mrf.mxu1  ;;  %v4570_v31 = vpop.f32.mrf.mxu0 }
 0x33e   : > { %2370 = vadd.xlane.f32.xlu0 %v5456_v49  ;;  %v2572_v54 = vadd.f32 %v2558_v4, %v4895_v17 }
 0x33f   : > { %v4578_v58 = vpop.f32.mrf.mxu1  ;;  %v5469_v26 = vpop.f32.mrf.mxu0 }
 0x340   : > { %v2568_v47 = vadd.f32 %v4578_v58, %v4570_v31  ;;  %v2576_v40 = vmax.f32 %v2572_v54, 0.0 }
 0x341   : > { %v5471_v36 = vpop.f32.mrf.mxu1  ;;  %v4583_v44 = vpop.f32.mrf.mxu0 }
 0x342   : > { %2372 = vadd.xlane.f32.xlu0 %v2365_v0  ;;  %v2574_v8 = vadd.f32 %v2568_v47, %v4900_v20  ;;  %v2586_v25 = vmul.f32 %v5077_v9, %v2576_v40 }
 0x343   : > { %v4591_v48 = vpop.f32.mrf.mxu1  ;;  %v5476_v57 = vpop.f32.mrf.mxu0 }
 0x344   : > { %v2578_v45 = vmax.f32 %v2574_v8, 0.0  ;;  %v2781_v35 = vadd.f32 %v4591_v48, %v4583_v44  ;;  %v2602_v6 = vmul.f32 %v2586_v25, %v2576_v40 }
 0x345   : > { %v5478_v13 = vpop.f32.mrf.mxu1  ;;  %v4586_v59 = vpop.f32.mrf.mxu0 }
 0x346   : > { %2384 = vadd.xlane.f32.xlu0 %v2379_v1  ;;  %v2588_v42 = vmul.f32 %v5077_v9, %v2578_v45  ;;  %v2795_v27 = vadd.f32 %v2781_v35, %v4895_v17 }
 0x347   : > { %v4594_v52 = vpop.f32.mrf.mxu1  ;;  %v5482_v60 = vpop.f32.mrf.mxu0 }
 0x348   : > { %v2791_v56 = vadd.f32 %v4594_v52, %v4586_v59  ;;  %v2799_v28 = vmax.f32 %v2795_v27, 0.0  ;;  %v2604_v34 = vmul.f32 %v2588_v42, %v2578_v45 }
 0x349   : > { %v5484_v32 = vpop.f32.mrf.mxu1  ;;  %v4599_v50 = vpop.f32.mrf.mxu0 }
 0x34a   : > { %2388 = vadd.xlane.f32.xlu0 %v2381_v61  ;;  %v2797_v22 = vadd.f32 %v2791_v56, %v4900_v20  ;;  %v2809_v0 = vmul.f32 %v5077_v9, %v2799_v28  ;;  %v2553_v56 = vadd.f32 %v5460_v37, %v5458_v53  ;;  %v2378_v53 = vmul.f32 %v5449_v43, %v2352_v10 }
 0x34b   : > { %3287 = vperm.xlu1 %4730, %v4742_v51   ;;  %v4607_v30 = vpop.f32.mrf.mxu1  ;;  %v5488_v31 = vpop.f32.mrf.mxu0 }
 0x34c   : > { %v2801_v4 = vmax.f32 %v2797_v22, 0.0  ;;  %v3004_v54 = vadd.f32 %v4607_v30, %v4599_v50  ;;  %v2825_v44 = vmul.f32 %v2809_v0, %v2799_v28  ;;  %v2571_v50 = vadd.f32 %v2553_v56, %v4884_v15 }
 0x34d   : > { %v5490_v58 = vpop.f32.mrf.mxu1  ;;  %v4602_v1 = vpop.f32.mrf.mxu0  ;;  %v2563_v30 = vadd.f32 %v5471_v36, %v5469_v26 }
 0x34e   : > { %2591 = vadd.xlane.f32.xlu0 %v2586_v25  ;;  %v2811_v47 = vmul.f32 %v5077_v9, %v2801_v4  ;;  %v3018_v8 = vadd.f32 %v3004_v54, %v4895_v17  ;;  %v2999_v56 = vadd.f32 %v5490_v58, %v5488_v31 }
 0x34f   : > { %v4610_v40 = vpop.f32.mrf.mxu1  ;;  %v5494_v48 = vpop.f32.mrf.mxu0 }
 0x350   : > { %v3014_v61 = vadd.f32 %v4610_v40, %v4602_v1  ;;  %v3022_v45 = vmax.f32 %v3018_v8, 0.0  ;;  %v2827_v35 = vmul.f32 %v2811_v47, %v2801_v4  ;;  %v2573_v1 = vadd.f32 %v2563_v30, %v4886_v16 }
 0x351   : > { %v5496_v51 = vpop.f32.mrf.mxu1  ;;  %v2380_v40 = vmul.f32 %v5456_v49, %v2354_v19 }
 0x352   : > { %2595 = vadd.xlane.f32.xlu0 %v2588_v42  ;;  %v3020_v25 = vadd.f32 %v3014_v61, %v4900_v20  ;;  %v4615_v42 = vpop.f32.mrf.mxu0  ;;  %v3032_v27 = vmul.f32 %v5077_v9, %v3022_v45  ;;  %v2577_v10 = vmax.f32 %v2573_v1, 0.0 }
 0x353   : > { %v4623_v59 = vpop.f32.mrf.mxu1 }
 0x354   : > { %v3024_v52 = vmax.f32 %v3020_v25, 0.0  ;;  %v3227_v22 = vadd.f32 %v4623_v59, %v4615_v42  ;;  %v2587_v41 = vmul.f32 %v5077_v9, %v2577_v10 }
 0x355   : > { %v5504_v28 = vpop.f32.mrf.mxu1 }
 0x356   : > { %2607 = vadd.xlane.f32.xlu0 %v2602_v6  ;;  %v5502_v6 = vpop.f32.mrf.mxu0  ;;  %v3241_v37 = vadd.f32 %v3227_v22, %v4895_v17  ;;  %v3009_v22 = vadd.f32 %v5496_v51, %v5494_v48 }
 0x357   : > { %v3222_v31 = vadd.f32 %v5504_v28, %v5502_v6 }
 0x358   : > { %v4618_v4 = vpop.f32.mrf.mxu0  ;;  %v3245_v26 = vmax.f32 %v3241_v37, 0.0  ;;  %v3019_v30 = vadd.f32 %v3009_v22, %v4886_v16 }
 0x359   : > { %v3240_v48 = vadd.f32 %v3222_v31, %v4884_v15 }
 0x35a   : > { %2611 = vadd.xlane.f32.xlu0 %v2604_v34  ;;  %v3034_v34 = vmul.f32 %v5077_v9, %v3024_v52  ;;  %v3255_v61 = vmul.f32 %v5077_v9, %v3245_v26  ;;  %v3146_v37 = vpop.f32.mrf.mxu0 }
 0x35c   : > { %v3050_v36 = vmul.f32 %v3034_v34, %v3024_v52  ;;  %v2603_v52 = vmul.f32 %v2587_v41, %v2577_v10  ;;  %v3511_v10 = vpop.permute.xlu0 %3510 }
 0x35e   : > { %2814 = vadd.xlane.f32.xlu0 %v2809_v0  ;;  %v4626_v0 = vpop.f32.mrf.mxu1 }
 0x35f   : > { %v3237_v54 = vadd.f32 %v4626_v0, %v4618_v4  ;;  %v3023_v0 = vmax.f32 %v3019_v30, 0.0 }
 0x361   : > { %v3243_v39 = vadd.f32 %v3237_v54, %v4900_v20  ;;  %v3033_v58 = vmul.f32 %v5077_v9, %v3023_v0  ;;  %v3231_v54 = vpop.f32.mrf.mxu1 }
 0x362   : > { %2818 = vadd.xlane.f32.xlu0 %v2811_v47  ;;  %v2575_v47 = vmax.f32 %v2571_v50, 0.0  ;;  %v3232_v51 = vadd.f32 %v3231_v54, %v3146_v37 }
 0x363   : > { %v3247_v8 = vmax.f32 %v3243_v39, 0.0 }
 0x364   : > { %v2585_v43 = vmul.f32 %v5077_v9, %v2575_v47  ;;  %v3242_v1 = vadd.f32 %v3232_v51, %v4886_v16 }
 0x365   : > { %v3257_v19 = vmul.f32 %v5077_v9, %v3247_v8 }
 0x366   : > { %2830 = vadd.xlane.f32.xlu0 %v2825_v44  ;;  %v2776_v44 = vadd.f32 %v5478_v13, %v5476_v57  ;;  %v2601_v25 = vmul.f32 %v2585_v43, %v2575_v47  ;;  %v3244_v47 = vmax.f32 %v3240_v48, 0.0 }
 0x367   : > { %v3273_v57 = vmul.f32 %v3257_v19, %v3247_v8 }
 0x368   : > { %v2794_v49 = vadd.f32 %v2776_v44, %v4884_v15  ;;  %v3254_v39 = vmul.f32 %v5077_v9, %v3244_v47  ;;  %v3513_v44 = vsub.f32 %v3511_v10, %v5297_v11 }
 0x36a   : > { %2834 = vadd.xlane.f32.xlu0 %v2827_v35  ;;  %v3271_v35 = vmul.f32 %v3255_v61, %v3245_v26  ;;  %v2798_v42 = vmax.f32 %v2794_v49, 0.0  ;;  %v3246_v26 = vmax.f32 %v3242_v1, 0.0  ;;  %v3270_v28 = vmul.f32 %v3254_v39, %v3244_v47 }
 0x36c   : > { %v3256_v6 = vmul.f32 %v5077_v9, %v3246_v26 }
 0x36e   : > { %3037 = vadd.xlane.f32.xlu0 %v3032_v27 }
 0x36f   : > { %2368 = vadd.xlane.f32.xlu1 %v5465_v21  ;;  %v3048_v21 = vmul.f32 %v3032_v27, %v3022_v45  ;;  %v2786_v45 = vadd.f32 %v5484_v32, %v5482_v60  ;;  %v2808_v27 = vmul.f32 %v5077_v9, %v2798_v42  ;;  %v3017_v32 = vadd.f32 %v2999_v56, %v4884_v15 }
 0x371   : > { %v2796_v59 = vadd.f32 %v2786_v45, %v4886_v16  ;;  %v3021_v50 = vmax.f32 %v3017_v32, 0.0 }
 0x372   : > { %3041 = vadd.xlane.f32.xlu0 %v3034_v34  ;;  %v2824_v34 = vmul.f32 %v2808_v27, %v2798_v42 }
 0x373   : > { %2382 = vadd.xlane.f32.xlu1 %v2378_v53  ;;  %v2800_v13 = vmax.f32 %v2796_v59, 0.0  ;;  %v3031_v53 = vmul.f32 %v5077_v9, %v3021_v50  ;;  %v3514_v59 = vand.u32 2147483647, %v3513_v44 }
 0x375   : > { %v2810_v60 = vmul.f32 %v5077_v9, %v2800_v13 }
 0x376   : > { %3053 = vadd.xlane.f32.xlu0 %v3048_v21  ;;  %v3047_v21 = vmul.f32 %v3031_v53, %v3021_v50 }
 0x377   : > { %2386 = vadd.xlane.f32.xlu1 %v2380_v40  ;;  %v2826_v4 = vmul.f32 %v2810_v60, %v2800_v13  ;;  %v3049_v40 = vmul.f32 %v3033_v58, %v3023_v0 }
 0x37a   : > { %3057 = vadd.xlane.f32.xlu0 %v3050_v36  ;;  %v3272_v36 = vmul.f32 %v3256_v6, %v3246_v26 }
 0x37b   : > { %2589 = vadd.xlane.f32.xlu1 %v2585_v43  ;;  %v3734_v43 = vpop.permute.xlu0 %3733 }
 0x37e   : > { %3260 = vadd.xlane.f32.xlu0 %v3255_v61 }
 0x37f   : > { %2593 = vadd.xlane.f32.xlu1 %v2587_v41 }
 0x382   : > { %3264 = vadd.xlane.f32.xlu0 %v3257_v19 }
 0x383   : > { %2605 = vadd.xlane.f32.xlu1 %v2601_v25 }
 0x386   : > { %3276 = vadd.xlane.f32.xlu0 %v3271_v35  ;;  %v3515_v35 = vmul.f32 %v5297_v11, %v3511_v10 }
 0x387   : > { %2609 = vadd.xlane.f32.xlu1 %v2603_v52  ;;  %v3736_v52 = vsub.f32 %v3734_v43, %v5297_v11 }
 0x389   : > { %v3737_v13 = vand.u32 2147483647, %v3736_v52 }
 0x38a   : > { %3280 = vadd.xlane.f32.xlu0 %v3273_v57 }
 0x38b   : > { %2812 = vadd.xlane.f32.xlu1 %v2808_v27 }
 0x38f   : > { %2816 = vadd.xlane.f32.xlu1 %v2810_v60 }
 0x393   : > { %2828 = vadd.xlane.f32.xlu1 %v2824_v34 }
 0x397   : > { %2832 = vadd.xlane.f32.xlu1 %v2826_v4 }
 0x39b   : > { %3035 = vadd.xlane.f32.xlu1 %v3031_v53 }
 0x39f   : > { %3039 = vadd.xlane.f32.xlu1 %v3033_v58 }
 0x3a3   : > { %3051 = vadd.xlane.f32.xlu1 %v3047_v21 }
 0x3a7   : > { %3055 = vadd.xlane.f32.xlu1 %v3049_v40 }
 0x3ab   : > { %3258 = vadd.xlane.f32.xlu1 %v3254_v39 }
 0x3af   : > { %3262 = vadd.xlane.f32.xlu1 %v3256_v6 }
 0x3b3   : > { %3274 = vadd.xlane.f32.xlu1 %v3270_v28 }
 0x3b7   : > { %3278 = vadd.xlane.f32.xlu1 %v3272_v36 }
 0x3c3   : > { %v2367_v8 = vpop.xlane.xlu1 %2366 }
 0x3c4   : > { %v5547_v61 = vadd.f32 %v2367_v8, %v5335_v7 }
 0x3c7   : > { %v3288_v41 = vpop.permute.xlu1 %3287  ;;  %v2371_v19 = vpop.xlane.xlu0 %2370 }
 0x3c8   : > { %v3290_v49 = vsub.f32 %v3288_v41, %v5297_v11  ;;  %v3292_v45 = vmul.f32 %v5297_v11, %v3288_v41  ;;  %v5553_v25 = vadd.f32 %v2371_v19, %v5301_v33  ;;  %v3738_v33 = vmul.f32 %v5297_v11, %v3734_v43 }
 0x3ca   : > { %v3291_v42 = vand.u32 2147483647, %v3290_v49  ;;  %4627 = vmatprep.subr.mxu0 %v3292_v45 }
 0x3cb   : > { %4628 = vmatpush3.msra.mxu0 %v3292_v45  ;;  %v2373_v7 = vpop.xlane.xlu0 %2372 }
 0x3cc   : > { %v2377_v57 = vadd.f32 %v2373_v7, %v5290_v14  ;;  %4635 = vmatprep.subr.mxu1 %v3291_v42  ;;  %4630 = vmatmul.mubr.msk.f32.vlgmr.msra.gmra.mxu0 %vm370_vm0, %v5308_v3 }
 0x3cd   : > { %4636 = vmatpush3.msra.mxu1 %v3291_v42  ;;  %4632 = vmatprep.mubr.msk.f32.mxu0 %vm370_vm0, %v5315_v46 }
 0x3ce   : > { %4638 = vmatmul.mubr.msk.f32.vlgmr.msra.gmra.mxu1 %vm370_vm0, %v5322_v23  ;;  %4643 = vmatprep.subr.mxu0 %v3515_v35 }
 0x3cf   : > { %v2385_v27 = vpop.xlane.xlu0 %2384  ;;  %4640 = vmatprep.mubr.msk.f32.mxu1 %vm370_vm0, %v5331_v63  ;;  %4651 = vmatprep.subr.mxu1 %v3514_v59 }
 0x3d0   : > { %v2391_v14 = vadd.f32 %v2385_v27, %v5284_v29  ;;  %4633 = vmatmul.mubr.msk.f32.gmra.mxu0 %vm370_vm0, %v5340_v62  ;;  %4652 = vmatpush3.msra.mxu1 %v3514_v59 }
 0x3d1   : > { %4644 = vmatpush3.msra.mxu0 %v3515_v35  ;;  %4645 = vmatprep.mubr.msk.f32.mxu0 %vm370_vm0, %v5347_v38 }
 0x3d2   : > { %4641 = vmatmul.mubr.msk.f32.gmra.mxu1 %vm370_vm0, %v5354_v18  ;;  %4659 = vmatprep.subr.mxu0 %v3738_v33 }
 0x3d3   : > { %v2389_v11 = vpop.xlane.xlu0 %2388  ;;  %4653 = vmatprep.mubr.msk.f32.mxu1 %vm370_vm0, %v5361_v5  ;;  %4667 = vmatprep.subr.mxu1 %v3737_v13 }
 0x3d4   : > { %v2393_v56 = vadd.f32 %v2389_v11, %v5326_v12  ;;  %4646 = vmatmul.mubr.msk.f32.vlgmr.msra.gmra.mxu0 %vm370_vm0, %v5308_v3 }
 0x3d5   : > { %4648 = vmatprep.mubr.msk.f32.mxu0 %vm370_vm0, %v5315_v46  ;;  %4660 = vmatpush3.msra.mxu0 %v3738_v33 }
 0x3d6   : > { %4654 = vmatmul.mubr.msk.f32.vlgmr.msra.gmra.mxu1 %vm370_vm0, %v5322_v23 }
 0x3d7   : > { %v2592_v29 = vpop.xlane.xlu0 %2591  ;;  %4656 = vmatprep.mubr.msk.f32.mxu1 %vm370_vm0, %v5331_v63  ;;  %4668 = vmatpush3.msra.mxu1 %v3737_v13 }
 0x3d8   : > { %4649 = vmatmul.mubr.msk.f32.gmra.mxu0 %vm370_vm0, %v5340_v62 }
 0x3d9   : > { %4661 = vmatprep.mubr.msk.f32.mxu0 %vm370_vm0, %v5347_v38 }
 0x3da   : > { %4657 = vmatmul.mubr.msk.f32.gmra.mxu1 %vm370_vm0, %v5354_v18 }
 0x3db   : > { %v2596_v12 = vpop.xlane.xlu0 %2595  ;;  %4669 = vmatprep.mubr.msk.f32.mxu1 %vm370_vm0, %v5361_v5 }
 0x3dc   : > { %v2600_v60 = vadd.f32 %v2596_v12, %v2377_v57  ;;  %4662 = vmatmul.mubr.msk.f32.vlgmr.msra.gmra.mxu0 %vm370_vm0, %v5308_v3 }
 0x3dd   : > { %4664 = vmatprep.mubr.msk.f32.mxu0 %vm370_vm0, %v5315_v46 }
 0x3de   : > { %4670 = vmatmul.mubr.msk.f32.vlgmr.msra.gmra.mxu1 %vm370_vm0, %v5322_v23 }
 0x3df   : > { %v2608_v32 = vpop.xlane.xlu0 %2607  ;;  %4672 = vmatprep.mubr.msk.f32.mxu1 %vm370_vm0, %v5331_v63 }
 0x3e0   : > { %v2614_v38 = vadd.f32 %v2608_v32, %v2391_v14  ;;  %4665 = vmatmul.mubr.msk.f32.gmra.mxu0 %vm370_vm0, %v5340_v62 }
 0x3e2   : > { %4673 = vmatmul.mubr.msk.f32.gmra.mxu1 %vm370_vm0, %v5354_v18 }
 0x3e3   : > { %v2612_v5 = vpop.xlane.xlu0 %2611 }
 0x3e4   : > { %v2616_v22 = vadd.f32 %v2612_v5, %v2393_v56 }
 0x3e7   : > { %v2815_v3 = vpop.xlane.xlu0 %2814 }
 0x3eb   : > { %v2819_v34 = vpop.xlane.xlu0 %2818 }
 0x3ec   : > { %v5605_v50 = vadd.f32 %v2819_v34, %v2600_v60 }
 0x3ef   : > { %v2831_v46 = vpop.xlane.xlu0 %2830 }
 0x3f0   : > { %v5607_v30 = vadd.f32 %v2831_v46, %v2614_v38 }
 0x3f3   : > { %v2835_v23 = vpop.xlane.xlu0 %2834 }
 0x3f4   : > { %v5609_v4 = vadd.f32 %v2835_v23, %v2616_v22 }
 0x3f8   : > { %v2369_v63 = vpop.xlane.xlu1 %2368 }
 0x3f9   : > { %v2375_v0 = vadd.f32 %v2369_v63, %v5278_v55 }
 0x3fb   : > { %v2598_v53 = vadd.f32 %v2592_v29, %v2375_v0 }
 0x3fc   : > { %v2383_v62 = vpop.xlane.xlu1 %2382 }
 0x3fd   : > { %v2390_v31 = vadd.f32 %v2383_v62, %v5293_v24  ;;  %v5613_v18 = vadd.f32 %v2815_v3, %v2598_v53 }
 0x400   : > { %v2387_v58 = vpop.xlane.xlu1 %2386 }
 0x401   : > { %v2392_v37 = vadd.f32 %v2387_v58, %v5287_v2 }
 0x404   : > { %v2590_v54 = vpop.xlane.xlu1 %2589 }
 0x405   : > { %v2597_v48 = vadd.f32 %v2590_v54, %v5547_v61 }
 0x408   : > { %v2594_v51 = vpop.xlane.xlu1 %2593 }
 0x409   : > { %v2599_v21 = vadd.f32 %v2594_v51, %v5553_v25 }
 0x40c   : > { %v2606_v47 = vpop.xlane.xlu1 %2605 }
 0x40d   : > { %v2613_v1 = vadd.f32 %v2606_v47, %v2390_v31 }
 0x410   : > { %v2610_v40 = vpop.xlane.xlu1 %2609 }
 0x411   : > { %v2615_v26 = vadd.f32 %v2610_v40, %v2392_v37 }
 0x414   : > { %v2813_v55 = vpop.xlane.xlu1 %2812 }
 0x415   : > { %v5618_v39 = vadd.f32 %v2813_v55, %v2597_v48 }
 0x418   : > { %v2817_v6 = vpop.xlane.xlu1 %2816 }
 0x419   : > { %v5620_v24 = vadd.f32 %v2817_v6, %v2599_v21 }
 0x41c   : > { %v2829_v28 = vpop.xlane.xlu1 %2828 }
 0x41d   : > { %v5622_v36 = vadd.f32 %v2829_v28, %v2613_v1 }
 0x420   : > { %v2833_v2 = vpop.xlane.xlu1 %2832 }
 0x421   : > { %v5624_v10 = vadd.f32 %v2833_v2, %v2615_v26 }
 0x48c   : > { %v4631_v43 = vpop.f32.mrf.mxu0 }
 0x48e   : > { %v4639_v8 = vpop.f32.mrf.mxu1  ;;  %v3359_v61 = vpop.f32.mrf.mxu0 }
 0x48f   : > { %v3450_v44 = vadd.f32 %v4639_v8, %v4631_v43 }
 0x490   : > { %v3444_v41 = vpop.f32.mrf.mxu1  ;;  %v4634_v19 = vpop.f32.mrf.mxu0 }
 0x491   : > { %v3464_v49 = vadd.f32 %v3450_v44, %v4895_v17  ;;  %v3445_v45 = vadd.f32 %v3444_v41, %v3359_v61 }
 0x492   : > { %v4642_v25 = vpop.f32.mrf.mxu1  ;;  %v3369_v35 = vpop.f32.mrf.mxu0 }
 0x493   : > { %v3468_v42 = vmax.f32 %v3464_v49, 0.0  ;;  %v3463_v59 = vadd.f32 %v3445_v45, %v4884_v15  ;;  %v3460_v52 = vadd.f32 %v4642_v25, %v4634_v19 }
 0x494   : > { %v3454_v7 = vpop.f32.mrf.mxu1  ;;  %v4647_v57 = vpop.f32.mrf.mxu0 }
 0x495   : > { %v3467_v33 = vmax.f32 %v3463_v59, 0.0  ;;  %v3466_v13 = vadd.f32 %v3460_v52, %v4900_v20  ;;  %v3455_v27 = vadd.f32 %v3454_v7, %v3369_v35  ;;  %v3478_v14 = vmul.f32 %v5077_v9, %v3468_v42 }
 0x496   : > { %v4655_v11 = vpop.f32.mrf.mxu1  ;;  %v3582_v56 = vpop.f32.mrf.mxu0 }
 0x497   : > { %v3470_v29 = vmax.f32 %v3466_v13, 0.0  ;;  %v3465_v12 = vadd.f32 %v3455_v27, %v4886_v16  ;;  %3483 = vadd.xlane.f32.xlu0 %v3478_v14  ;;  %v3477_v60 = vmul.f32 %v5077_v9, %v3467_v33  ;;  %v3673_v22 = vadd.f32 %v4655_v11, %v4647_v57 }
 0x498   : > { %v3667_v32 = vpop.f32.mrf.mxu1  ;;  %v4650_v38 = vpop.f32.mrf.mxu0  ;;  %v3494_v31 = vmul.f32 %v3478_v14, %v3468_v42 }
 0x499   : > { %v3469_v5 = vmax.f32 %v3465_v12, 0.0  ;;  %3481 = vadd.xlane.f32.xlu1 %v3477_v60  ;;  %v3480_v3 = vmul.f32 %v5077_v9, %v3470_v29  ;;  %v3668_v46 = vadd.f32 %v3667_v32, %v3582_v56  ;;  %v3687_v53 = vadd.f32 %v3673_v22, %v4895_v17 }
 0x49a   : > { %v4658_v34 = vpop.f32.mrf.mxu1  ;;  %v3592_v63 = vpop.f32.mrf.mxu0  ;;  %v3493_v54 = vmul.f32 %v3477_v60, %v3467_v33 }
 0x49b   : > { %3487 = vadd.xlane.f32.xlu0 %v3480_v3  ;;  %v3479_v23 = vmul.f32 %v5077_v9, %v3469_v5  ;;  %v3683_v62 = vadd.f32 %v4658_v34, %v4650_v38  ;;  %v3686_v58 = vadd.f32 %v3668_v46, %v4884_v15  ;;  %v3691_v21 = vmax.f32 %v3687_v53, 0.0  ;;  %v3038_v34 = vpop.xlane.xlu0 %3037  ;;  %v3036_v46 = vpop.xlane.xlu1 %3035 }
 0x49c   : > { %v3677_v0 = vpop.f32.mrf.mxu1  ;;  %v4663_v48 = vpop.f32.mrf.mxu0  ;;  %v3496_v1 = vmul.f32 %v3480_v3, %v3470_v29 }
 0x49d   : > { %3485 = vadd.xlane.f32.xlu1 %v3479_v23  ;;  %v3678_v37 = vadd.f32 %v3677_v0, %v3592_v63  ;;  %v3689_v47 = vadd.f32 %v3683_v62, %v4900_v20  ;;  %v3690_v40 = vmax.f32 %v3686_v58, 0.0  ;;  %v3495_v55 = vmul.f32 %v3479_v23, %v3469_v5 }
 0x49e   : > { %v4671_v51 = vpop.f32.mrf.mxu1  ;;  %v3805_v6 = vpop.f32.mrf.mxu0  ;;  %v3701_v43 = vmul.f32 %v5077_v9, %v3691_v21 }
 0x49f   : > { %3499 = vadd.xlane.f32.xlu0 %v3494_v31  ;;  %v3688_v26 = vadd.f32 %v3678_v37, %v4886_v16  ;;  %v3693_v2 = vmax.f32 %v3689_v47, 0.0  ;;  %v3700_v61 = vmul.f32 %v5077_v9, %v3690_v40  ;;  %v3896_v19 = vadd.f32 %v4671_v51, %v4663_v48  ;;  %v3042_v23 = vpop.xlane.xlu0 %3041  ;;  %v3040_v63 = vpop.xlane.xlu1 %3039 }
 0x4a0   : > { %v3890_v28 = vpop.f32.mrf.mxu1  ;;  %v4666_v44 = vpop.f32.mrf.mxu0  ;;  %v3717_v7 = vmul.f32 %v3701_v43, %v3691_v21 }
 0x4a1   : > { %3497 = vadd.xlane.f32.xlu1 %v3493_v54  ;;  %v3692_v8 = vmax.f32 %v3688_v26, 0.0  ;;  %v3703_v49 = vmul.f32 %v5077_v9, %v3693_v2  ;;  %v3891_v45 = vadd.f32 %v3890_v28, %v3805_v6  ;;  %v3910_v59 = vadd.f32 %v3896_v19, %v4895_v17 }
 0x4a2   : > { %v4674_v41 = vpop.f32.mrf.mxu1  ;;  %v3815_v35 = vpop.f32.mrf.mxu0  ;;  %v3716_v13 = vmul.f32 %v3700_v61, %v3690_v40 }
 0x4a3   : > { %3503 = vadd.xlane.f32.xlu0 %v3496_v1  ;;  %v3702_v25 = vmul.f32 %v5077_v9, %v3692_v8  ;;  %v3906_v52 = vadd.f32 %v4674_v41, %v4666_v44  ;;  %v3909_v57 = vadd.f32 %v3891_v45, %v4884_v15  ;;  %v3914_v27 = vmax.f32 %v3910_v59, 0.0  ;;  %v3054_v0 = vpop.xlane.xlu0 %3053  ;;  %v3052_v53 = vpop.xlane.xlu1 %3051 }
 0x4a4   : > { %v3900_v42 = vpop.f32.mrf.mxu1  ;;  %v3719_v11 = vmul.f32 %v3703_v49, %v3693_v2  ;;  %v3046_v59 = vadd.f32 %v3042_v23, %v5605_v50 }
 0x4a5   : > { %3501 = vadd.xlane.f32.xlu1 %v3495_v55  ;;  %v3901_v33 = vadd.f32 %v3900_v42, %v3815_v35  ;;  %v3912_v14 = vadd.f32 %v3906_v52, %v4900_v20  ;;  %v3913_v56 = vmax.f32 %v3909_v57, 0.0  ;;  %v3718_v12 = vmul.f32 %v3702_v25, %v3692_v8 }
 0x4a6   : > { %v3924_v17 = vmul.f32 %v5077_v9, %v3914_v27  ;;  %v3043_v35 = vadd.f32 %v3036_v46, %v5618_v39 }
 0x4a7   : > { %3706 = vadd.xlane.f32.xlu0 %v3701_v43  ;;  %v3911_v29 = vadd.f32 %v3901_v33, %v4886_v16  ;;  %v3916_v60 = vmax.f32 %v3912_v14, 0.0  ;;  %v3923_v15 = vmul.f32 %v5077_v9, %v3913_v56  ;;  %v3058_v62 = vpop.xlane.xlu0 %3057  ;;  %v3056_v31 = vpop.xlane.xlu1 %3055 }
 0x4a8   : > { %v3940_v5 = vmul.f32 %v3924_v17, %v3914_v27 }
 0x4a9   : > { %3704 = vadd.xlane.f32.xlu1 %v3700_v61  ;;  %v3915_v32 = vmax.f32 %v3911_v29, 0.0  ;;  %v3926_v38 = vmul.f32 %v5077_v9, %v3916_v60  ;;  %v3939_v16 = vmul.f32 %v3923_v15, %v3913_v56 }
 0x4ab   : > { %3710 = vadd.xlane.f32.xlu0 %v3703_v49  ;;  %v3925_v20 = vmul.f32 %v5077_v9, %v3915_v32  ;;  %v3942_v22 = vmul.f32 %v3926_v38, %v3916_v60  ;;  %v3261_v58 = vpop.xlane.xlu0 %3260  ;;  %v3259_v37 = vpop.xlane.xlu1 %3258  ;;  %v3044_v49 = vadd.f32 %v3038_v34, %v5613_v18  ;;  %v3059_v60 = vadd.f32 %v3052_v53, %v5622_v36 }
 0x4ac   : > { %v3266_v52 = vadd.f32 %v3259_v37, %v3043_v35  ;;  %v3061_v36 = vadd.f32 %v3056_v31, %v5624_v10 }
 0x4ad   : > { %3708 = vadd.xlane.f32.xlu1 %v3702_v25  ;;  %v3941_v3 = vmul.f32 %v3925_v20, %v3915_v32  ;;  %v3267_v25 = vadd.f32 %v3261_v58, %v3044_v49 }
 0x4af   : > { %3722 = vadd.xlane.f32.xlu0 %v3717_v7  ;;  %v3265_v9 = vpop.xlane.xlu0 %3264  ;;  %v3263_v54 = vpop.xlane.xlu1 %3262 }
 0x4b0   : > { %v3269_v33 = vadd.f32 %v3265_v9, %v3046_v59 }
 0x4b1   : > { %3720 = vadd.xlane.f32.xlu1 %v3716_v13  ;;  %v3045_v13 = vadd.f32 %v3040_v63, %v5620_v24 }
 0x4b3   : > { %3726 = vadd.xlane.f32.xlu0 %v3719_v11  ;;  %v3277_v48 = vpop.xlane.xlu0 %3276  ;;  %v3275_v51 = vpop.xlane.xlu1 %3274  ;;  %v3060_v11 = vadd.f32 %v3054_v0, %v5607_v30  ;;  %v3268_v18 = vadd.f32 %v3263_v54, %v3045_v13 }
 0x4b5   : > { %3724 = vadd.xlane.f32.xlu1 %v3718_v12  ;;  %v3283_v12 = vadd.f32 %v3277_v48, %v3060_v11 }
 0x4b7   : > { %3929 = vadd.xlane.f32.xlu0 %v3924_v17  ;;  %v3281_v21 = vpop.xlane.xlu0 %3280  ;;  %v3279_v47 = vpop.xlane.xlu1 %3278 }
 0x4b8   : > { %v3284_v0 = vadd.f32 %v3279_v47, %v3061_v36 }
 0x4b9   : > { %3927 = vadd.xlane.f32.xlu1 %v3923_v15  ;;  %v3062_v15 = vadd.f32 %v3058_v62, %v5609_v4 }
 0x4bb   : > { %3933 = vadd.xlane.f32.xlu0 %v3926_v38 }
 0x4bd   : > { %3931 = vadd.xlane.f32.xlu1 %v3925_v20  ;;  %v3282_v20 = vadd.f32 %v3275_v51, %v3059_v60 }
 0x4bf   : > { %3945 = vadd.xlane.f32.xlu0 %v3940_v5 }
 0x4c1   : > { %3943 = vadd.xlane.f32.xlu1 %v3939_v16 }
 0x4c3   : > { %3949 = vadd.xlane.f32.xlu0 %v3942_v22 }
 0x4c5   : > { %3947 = vadd.xlane.f32.xlu1 %v3941_v3  ;;  %v3285_v3 = vadd.f32 %v3281_v21, %v3062_v15 }
 0x520   : > { %v3484_v1 = vpop.xlane.xlu0 %3483 }
 0x521   : > { %v3490_v7 = vadd.f32 %v3484_v1, %v3267_v25 }
 0x522   : > { %v3482_v40 = vpop.xlane.xlu1 %3481 }
 0x523   : > { %v3489_v27 = vadd.f32 %v3482_v40, %v3266_v52 }
 0x524   : > { %v3488_v26 = vpop.xlane.xlu0 %3487 }
 0x525   : > { %v3492_v39 = vadd.f32 %v3488_v26, %v3269_v33 }
 0x526   : > { %v3486_v55 = vpop.xlane.xlu1 %3485 }
 0x527   : > { %v3491_v17 = vadd.f32 %v3486_v55, %v3268_v18 }
 0x528   : > { %v3500_v6 = vpop.xlane.xlu0 %3499 }
 0x529   : > { %v3506_v5 = vadd.f32 %v3500_v6, %v3283_v12 }
 0x52a   : > { %v3498_v28 = vpop.xlane.xlu1 %3497 }
 0x52b   : > { %v3505_v46 = vadd.f32 %v3498_v28, %v3282_v20 }
 0x52c   : > { %v3504_v2 = vpop.xlane.xlu0 %3503 }
 0x52d   : > { %v3508_v53 = vadd.f32 %v3504_v2, %v3285_v3 }
 0x52e   : > { %v3502_v43 = vpop.xlane.xlu1 %3501 }
 0x52f   : > { %v3507_v9 = vadd.f32 %v3502_v43, %v3284_v0 }
 0x530   : > { %v3707_v8 = vpop.xlane.xlu0 %3706 }
 0x531   : > { %v3713_v14 = vadd.f32 %v3707_v8, %v3490_v7 }
 0x532   : > { %v3705_v61 = vpop.xlane.xlu1 %3704 }
 0x533   : > { %v3712_v56 = vadd.f32 %v3705_v61, %v3489_v27 }
 0x534   : > { %v3711_v44 = vpop.xlane.xlu0 %3710 }
 0x535   : > { %v3715_v30 = vadd.f32 %v3711_v44, %v3492_v39 }
 0x536   : > { %v3709_v41 = vpop.xlane.xlu1 %3708 }
 0x537   : > { %v3714_v16 = vadd.f32 %v3709_v41, %v3491_v17 }
 0x538   : > { %v3723_v19 = vpop.xlane.xlu0 %3722 }
 0x539   : > { %v3729_v23 = vadd.f32 %v3723_v19, %v3506_v5 }
 0x53a   : > { %v3721_v45 = vpop.xlane.xlu1 %3720 }
 0x53b   : > { %v3728_v62 = vadd.f32 %v3721_v45, %v3505_v46 }
 0x53c   : > { %v3727_v42 = vpop.xlane.xlu0 %3726 }
 0x53d   : > { %v3731_v10 = vadd.f32 %v3727_v42, %v3508_v53 }
 0x53e   : > { %v3725_v57 = vpop.xlane.xlu1 %3724 }
 0x53f   : > { %v3730_v48 = vadd.f32 %v3725_v57, %v3507_v9 }
 0x540   : > { %v3930_v50 = vpop.xlane.xlu0 %3929 }
 0x541   : > { %v3936_v29 = vadd.f32 %v3930_v50, %v3713_v14 }
 0x542   : > { %v3928_v24 = vpop.xlane.xlu1 %3927 }
 0x543   : > { %3957 = vst.msk [vmem:[%s5661_s11 + $0x8] sm:$0xff] %vm3955_vm2, %v3936_v29  ;;  %v3935_v32 = vadd.f32 %v3928_v24, %v3712_v56 }
 0x544   : > { %v3934_v38 = vpop.xlane.xlu0 %3933 }
 0x545   : > { %3956 = vst.msk [vmem:[%s5661_s11] sm:$0xff] %vm3955_vm2, %v3935_v32  ;;  %v3938_v22 = vadd.f32 %v3934_v38, %v3715_v30 }
 0x546   : > { %v3932_v34 = vpop.xlane.xlu1 %3931 }
 0x547   : > { %3959 = vst.msk [vmem:[%s5661_s11 + $0x18] sm:$0xff] %vm3955_vm2, %v3938_v22  ;;  %v3937_v63 = vadd.f32 %v3932_v34, %v3714_v16 }
 0x548   : > { %v3946_v4 = vpop.xlane.xlu0 %3945 }
 0x549   : > { %3958 = vst.msk [vmem:[%s5661_s11 + $0x10] sm:$0xff] %vm3955_vm2, %v3937_v63  ;;  %v3952_v58 = vadd.f32 %v3946_v4, %v3729_v23 }
 0x54a   : > { %v3944_v37 = vpop.xlane.xlu1 %3943 }
 0x54b   : > { %3961 = vst.msk [vmem:[%s321_s15 + $0x8] sm:$0xff] %vm3955_vm2, %v3952_v58  ;;  %v3951_v31 = vadd.f32 %v3944_v37, %v3728_v62 }
 0x54c   : > { %v3950_v54 = vpop.xlane.xlu0 %3949 }
 0x54d   : > { %3960 = vst.msk [vmem:[%s321_s15] sm:$0xff] %vm3955_vm2, %v3951_v31  ;;  %v3954_v51 = vadd.f32 %v3950_v54, %v3731_v10 }
 0x54e   : > { %v3948_v21 = vpop.xlane.xlu1 %3947 }
 0x54f   : > { %3963 = vst.msk [vmem:[%s321_s15 + $0x18] sm:$0xff] %vm3955_vm2, %v3954_v51  ;;  %v3953_v47 = vadd.f32 %v3948_v21, %v3730_v48 }
 0x551   : > { %3962 = vst.msk [vmem:[%s321_s15 + $0x10] sm:$0xff] %vm3955_vm2, %v3953_v47 }
 0x552 PF: > { %s17_s23 = sadd.s32 1, %s4765_s23   ;;  %s5699_s21 = smov %s4761_s22 }
 0x553   : > { %p14_p5 = scmp.ge.s32.totalorder %s17_s23, 4   ;;  %s5700_s22 = smov %s5702_s24 }
 0x555   :  { %16 = sbr.rel (!%p14_p5) target bundleno = 2 (0x2), region = 85 }

</bundles_post_ra>
